<compile_context>
chip_gen: v7x
topology: tpu7x:2x2x1
jax: 0.10.0
libtpu: 0.0.40
codegen_flags: <defaults>
</compile_context>

<pallas_src>
import jax
import jax.numpy as jnp
from jax.experimental import pallas as pl
from jax.experimental.pallas import tpu as pltpu

# ---- config.get_option(...) stand-ins (small, deterministic) -----------------
WORD_VOCAB = 50          # len(vocab['WordVocab'])
TAG_VOCAB = 12           # len(vocab['TagVocab'])
SEMTAG_VOCAB = 8         # len(vocab['SemTagVocab']) = number of output labels
WORD_DIM = 16
POS_DIM = 16
RNN_LAYERS = 2
RNN_HIDDEN = 32          # bidirectional -> per-direction hidden = 16
PRED_HIDDEN = 32
ROLE_HIDDEN = 32
SEQ_LEN = 8
N_PRED = 2
ACTIVATE = jax.nn.relu   # config 'activate'


# --------------------------- fused forward kernel -----------------------------
def _fused_srl_kernel(words_ref, pos_ref, preds_ref,            # (S,1)/(P,1) int32
                      emb_ref,                                  # (Vw+Vt, Dw+Dp)
                      wih0_ref, whh0_ref, b0_ref,               # merged biLSTM layer 0
                      wih1_ref, whh1_ref, b1_ref,               # merged biLSTM layer 1
                      wmlp_ref, bmlp_ref,                       # fused role|pred MLP
                      ut_ref, ub_ref,                           # folded biaffine U
                      rept_ref, repb_ref, sel_ref,              # pred replication / label selector
                      out_ref):                                 # (S, P*L)
    f32 = jnp.float32
    S = words_ref.shape[0]
    P = preds_ref.shape[0]
    V = emb_ref.shape[0]
    L = sel_ref.shape[1]
    R = ut_ref.shape[0]            # role_hidden
    H2 = whh0_ref.shape[0]         # 2H = both directions' hidden state, concatenated
    H = H2 // 2                    # per-direction hidden
    G = whh0_ref.shape[1]          # 8H = 2 directions x 4 gates (128 lanes)

    # ---- embedding lookup: ONE two-hot matmul against the block-diag table ---
    vocab_iota = jax.lax.broadcasted_iota(jnp.int32, (S, V), 1)
    twohot = ((vocab_iota == words_ref[...]).astype(f32)
              + (vocab_iota == pos_ref[...]).astype(f32))                  # (S, V)
    x = jnp.dot(twohot, emb_ref[...], preferred_element_type=f32)          # (S, in_dim)

    # hoisted lane masks, shared by both layers
    lane_g = jax.lax.broadcasted_iota(jnp.int32, (1, G), 1)
    fwd_cols = (lane_g % (2 * H)) < H          # forward-direction gate columns
    lane_h = jax.lax.broadcasted_iota(jnp.int32, (1, H2), 1)
    fwd_half = lane_h < H                      # forward half of h/c state

    # ---- stacked biLSTM, both directions merged into one 128-lane cell -------
    def bilstm_layer(x_in, wih, whh, b):
        # hoisted input projection for BOTH directions: one (S,in)@(in,8H)
        pre = jnp.dot(x_in, wih, preferred_element_type=f32) + b           # (S, G)
        h = jnp.zeros((1, H2), f32)            # [h_f | h_b]
        c = jnp.zeros((1, H2), f32)            # [c_f | c_b]
        hs = [None] * S
        for t in range(S):                     # fully unrolled (LLO visibility)
            tb = S - 1 - t
            # fwd gates take pre[t], bwd gates take pre[S-1-t]: one lane select
            pre_row = jnp.where(fwd_cols, pre[t:t + 1, :], pre[tb:tb + 1, :])
            g = pre_row + jnp.dot(h, whh, preferred_element_type=f32)      # (1, G)
            # grouped gate layout [i | f | o | g], each 2H wide (f/b interleaved)
            sig = jax.nn.sigmoid(g[:, :3 * H2])
            i_g = sig[:, 0 * H2:1 * H2]
            f_g = sig[:, 1 * H2:2 * H2]
            o_g = sig[:, 2 * H2:3 * H2]
            g_g = jnp.tanh(g[:, 3 * H2:4 * H2])
            c = f_g * c + i_g * g_g
            h = o_g * jnp.tanh(c)
            hs[t] = h                          # [h_f[t] | h_b[S-1-t]]
        # row s of the layer output is [h_f[s] | h_b[s]]: pure lane select
        rows = [jnp.where(fwd_half, hs[s], hs[S - 1 - s]) for s in range(S)]
        return jnp.concatenate(rows, axis=0)                               # (S, 2H)

    x = bilstm_layer(x, wih0_ref[...], whh0_ref[...], b0_ref[...])
    rnn_out = bilstm_layer(x, wih1_ref[...], whh1_ref[...], b1_ref[...])   # (S, 2H)

    # ---- fused role|pred MLP + predicate one-hot select (no VMEM round trip) -
    mlp = ACTIVATE(jnp.dot(rnn_out, wmlp_ref[...], preferred_element_type=f32)
                   + bmlp_ref[...])                                        # (S, R+D)
    role = mlp[:, :R]                                                      # (S, R)
    seq_iota = jax.lax.broadcasted_iota(jnp.int32, (P, S), 1)
    ph = (seq_iota == preds_ref[...]).astype(f32)                          # (P, S)
    pred = jnp.dot(ph, mlp, preferred_element_type=f32)[:, R:]             # (P, D)

    # ---- biaffine: score[s,p,l] = [role,1][s] @ U[l] @ [pred,1][p] ------------
    # stage 1: role-side ones column folded into ut/ub
    T = jnp.dot(role, ut_ref[...], preferred_element_type=f32) + ub_ref[...]      # (S, L*(D+1))
    # pred replication over labels via constant matmul; ones column folded in repb
    pred_w = (jnp.dot(pred, rept_ref[...], preferred_element_type=f32)
              + repb_ref[...])                                                    # (P, L*(D+1))
    # stage 2: per predicate (P=2), segmented sum over d with the 0/1 selector
    cols = [jnp.dot(T * pred_w[p:p + 1, :], sel_ref[...],
                    preferred_element_type=f32) for p in range(P)]                # (S, L) each
    out_ref[...] = jnp.concatenate(cols, axis=1)                                  # (S, P*L)


# --------------------------- wrapper-side packing ------------------------------
def _pack_dir_cols(wf, wb, H):
    # PyTorch per-direction gate order [i, f, g, o] (columns) -> merged grouped
    # layout [i_f,i_b | f_f,f_b | o_f,o_b | g_f,g_b]
    return jnp.concatenate([wf[:, 0 * H:1 * H], wb[:, 0 * H:1 * H],   # i
                            wf[:, 1 * H:2 * H], wb[:, 1 * H:2 * H],   # f
                            wf[:, 3 * H:4 * H], wb[:, 3 * H:4 * H],   # o
                            wf[:, 2 * H:3 * H], wb[:, 2 * H:3 * H]],  # g
                           axis=1)


def _pack_lstm_layer(lp, H):
    wih = _pack_dir_cols(lp['wih_f'], lp['wih_b'], H)                 # (in, 8H)
    b = _pack_dir_cols(lp['b_f'], lp['b_b'], H)                       # (1, 8H)
    wf, wb = lp['whh_f'], lp['whh_b']
    z = jnp.zeros((H, H), jnp.float32)
    # block-diagonal recurrence: h_f rows feed only forward-gate columns, etc.
    top = jnp.concatenate([wf[:, 0:H], z, wf[:, H:2 * H], z,
                           wf[:, 3 * H:4 * H], z, wf[:, 2 * H:3 * H], z], axis=1)
    bot = jnp.concatenate([z, wb[:, 0:H], z, wb[:, H:2 * H],
                           z, wb[:, 3 * H:4 * H], z, wb[:, 2 * H:3 * H]], axis=1)
    whh = jnp.concatenate([top, bot], axis=0)                         # (2H, 8H)
    return wih, whh, b


# ------------------------------- forward ---------------------------------------
def biaffine_srl_forward(params, words, lemmas, postags, predicates):
    del lemmas  # unused by the reference forward (as in the PyTorch code)
    S = words.shape[0]
    P = predicates.shape[0]
    L = SEMTAG_VOCAB
    R = ROLE_HIDDEN
    D = PRED_HIDDEN
    H = RNN_HIDDEN // 2

    # --- parameter re-packing (layout-only, tiny; fused by XLA under jit) -----
    # block-diagonal embedding table: one two-hot matmul replaces both gathers
    emb_cat = jnp.zeros((WORD_VOCAB + TAG_VOCAB, WORD_DIM + POS_DIM), jnp.float32)
    emb_cat = emb_cat.at[:WORD_VOCAB, :WORD_DIM].set(params['word_emb'])
    emb_cat = emb_cat.at[WORD_VOCAB:, WORD_DIM:].set(params['pos_emb'])

    wih0, whh0, b0 = _pack_lstm_layer(params['lstm'][0], H)
    wih1, whh1, b1 = _pack_lstm_layer(params['lstm'][1], H)

    # fused role|pred MLP
    w_mlp = jnp.concatenate([params['w_role'], params['w_pred']], axis=1)   # (2H, R+D)
    b_mlp = jnp.concatenate([params['b_role'], params['b_pred']], axis=1)   # (1, R+D)

    # Dozat-Manning U (L, R+1, D+1) -> (R+1, L*(D+1)); split off role-bias row
    u_perm = jnp.transpose(params['u'], (1, 0, 2)).reshape(R + 1, L * (D + 1))
    u_top, u_brow = u_perm[:R, :], u_perm[R:, :]
    j = jnp.arange(L * (D + 1))
    # pred replication matrix rep[d, l*(D+1)+d'] = (d == d'); ones row split off
    rep = (jnp.arange(D + 1)[:, None] == (j % (D + 1))[None, :]).astype(jnp.float32)
    rep_top, rep_bot = rep[:D, :], rep[D:, :]
    # label selector sel[l*(D+1)+d, l'] = (l == l')
    sel = ((j[:, None] // (D + 1)) == jnp.arange(L)[None, :]).astype(jnp.float32)

    # ids as (N,1) int32 columns (lane-broadcastable against iota in-kernel)
    words2 = words.astype(jnp.int32).reshape(S, 1)
    pos2 = (postags.astype(jnp.int32) + WORD_VOCAB).reshape(S, 1)
    preds2 = predicates.astype(jnp.int32).reshape(P, 1)

    vmem = pl.BlockSpec(memory_space=pltpu.MemorySpace.VMEM)
    scores_flat = pl.pallas_call(
        _fused_srl_kernel,
        out_shape=jax.ShapeDtypeStruct((S, P * L), jnp.float32),
        in_specs=[vmem] * 17,
        out_specs=vmem,
    )(words2, pos2, preds2, emb_cat,
      wih0, whh0, b0, wih1, whh1, b1,
      w_mlp, b_mlp, u_top, u_brow, rep_top, rep_bot, sel)

    # metadata-only reshape: (S, P*L) -> (S, P, L) == (token, predicate, label)
    return scores_flat.reshape(S, P, L)


# --------------------------- parameter init ------------------------------------
def init_params(key):
    scale = 0.1
    ks = jax.random.split(key, 12)
    params = {}
    params['word_emb'] = scale * jax.random.normal(ks[0], (WORD_VOCAB, WORD_DIM),
                                                   jnp.float32)
    params['pos_emb'] = scale * jax.random.normal(ks[1], (TAG_VOCAB, POS_DIM),
                                                  jnp.float32)
    h = RNN_HIDDEN // 2
    lstm = []
    for layer in range(RNN_LAYERS):
        in_dim = (WORD_DIM + POS_DIM) if layer == 0 else RNN_HIDDEN
        lk = jax.random.split(ks[2 + layer], 6)
        lstm.append(dict(
            wih_f=scale * jax.random.normal(lk[0], (in_dim, 4 * h), jnp.float32),
            whh_f=scale * jax.random.normal(lk[1], (h, 4 * h), jnp.float32),
            b_f=scale * jax.random.normal(lk[2], (1, 4 * h), jnp.float32),
            wih_b=scale * jax.random.normal(lk[3], (in_dim, 4 * h), jnp.float32),
            whh_b=scale * jax.random.normal(lk[4], (h, 4 * h), jnp.float32),
            b_b=scale * jax.random.normal(lk[5], (1, 4 * h), jnp.float32),
        ))
    params['lstm'] = lstm
    params['w_pred'] = scale * jax.random.normal(ks[6], (RNN_HIDDEN, PRED_HIDDEN),
                                                 jnp.float32)
    params['b_pred'] = scale * jax.random.normal(ks[7], (1, PRED_HIDDEN),
                                                 jnp.float32)
    params['w_role'] = scale * jax.random.normal(ks[8], (RNN_HIDDEN, ROLE_HIDDEN),
                                                 jnp.float32)
    params['b_role'] = scale * jax.random.normal(ks[9], (1, ROLE_HIDDEN),
                                                 jnp.float32)
    params['u'] = scale * jax.random.normal(
        ks[10], (SEMTAG_VOCAB, ROLE_HIDDEN + 1, PRED_HIDDEN + 1), jnp.float32)
    return params


# ------------------------------- main -------------------------------------------
if __name__ == "__main__":
    key = jax.random.PRNGKey(0)
    pkey, wkey, lkey, tkey = jax.random.split(key, 4)
    params = init_params(pkey)

    words = jax.random.randint(wkey, (SEQ_LEN,), 0, WORD_VOCAB, dtype=jnp.int32)
    lemmas = jax.random.randint(lkey, (SEQ_LEN,), 0, WORD_VOCAB, dtype=jnp.int32)
    postags = jax.random.randint(tkey, (SEQ_LEN,), 0, TAG_VOCAB, dtype=jnp.int32)
    predicates = jnp.array([1, 5], dtype=jnp.int32)          # N_PRED predicate tokens

    fwd = jax.jit(biaffine_srl_forward)
    out = fwd(params, words, lemmas, postags, predicates)
    out = jax.block_until_ready(out)
    assert out.shape == (SEQ_LEN, N_PRED, SEMTAG_VOCAB), out.shape
    assert out.dtype == jnp.float32
    print("KERNEL_OK")
</pallas_src>

<mosaic_0001>
module attributes {stable_mosaic.version = 11 : i64} {
  func.func @_fused_srl_kernel(%arg0: memref<8x1xi32, #tpu.memory_space<vmem>>, %arg1: memref<8x1xi32, #tpu.memory_space<vmem>>, %arg2: memref<2x1xi32, #tpu.memory_space<vmem>>, %arg3: memref<62x32xf32, #tpu.memory_space<vmem>>, %arg4: memref<32x128xf32, #tpu.memory_space<vmem>>, %arg5: memref<32x128xf32, #tpu.memory_space<vmem>>, %arg6: memref<1x128xf32, #tpu.memory_space<vmem>>, %arg7: memref<32x128xf32, #tpu.memory_space<vmem>>, %arg8: memref<32x128xf32, #tpu.memory_space<vmem>>, %arg9: memref<1x128xf32, #tpu.memory_space<vmem>>, %arg10: memref<32x64xf32, #tpu.memory_space<vmem>>, %arg11: memref<1x64xf32, #tpu.memory_space<vmem>>, %arg12: memref<32x264xf32, #tpu.memory_space<vmem>>, %arg13: memref<1x264xf32, #tpu.memory_space<vmem>>, %arg14: memref<32x264xf32, #tpu.memory_space<vmem>>, %arg15: memref<1x264xf32, #tpu.memory_space<vmem>>, %arg16: memref<264x8xf32, #tpu.memory_space<vmem>>, %arg17: memref<8x16xf32, #tpu.memory_space<vmem>>) attributes {dimension_semantics = [], scalar_prefetch = 0 : i64, scratch_operands = 0 : i64, tpu.core_type = #tpu.core_type<tc>} {
    %0 = tpu.iota {dimensions = array<i32: 1>} : vector<8x62xi32>
    %c0 = arith.constant 0 : index
    %c0_0 = arith.constant 0 : index
    %1 = vector.load %arg0[%c0, %c0_0] : memref<8x1xi32, #tpu.memory_space<vmem>>, vector<8x1xi32>
    %2 = vector.broadcast %1 : vector<8x1xi32> to vector<8x62xi32>
    %3 = arith.cmpi eq, %0, %2 : vector<8x62xi32>
    %4 = arith.extui %3 : vector<8x62xi1> to vector<8x62xi32>
    %5 = arith.sitofp %4 : vector<8x62xi32> to vector<8x62xf32>
    %c0_1 = arith.constant 0 : index
    %c0_2 = arith.constant 0 : index
    %6 = vector.load %arg1[%c0_1, %c0_2] : memref<8x1xi32, #tpu.memory_space<vmem>>, vector<8x1xi32>
    %7 = vector.broadcast %6 : vector<8x1xi32> to vector<8x62xi32>
    %8 = arith.cmpi eq, %0, %7 : vector<8x62xi32>
    %9 = arith.extui %8 : vector<8x62xi1> to vector<8x62xi32>
    %10 = arith.sitofp %9 : vector<8x62xi32> to vector<8x62xf32>
    %11 = arith.addf %5, %10 : vector<8x62xf32>
    %c0_3 = arith.constant 0 : index
    %c0_4 = arith.constant 0 : index
    %12 = vector.load %arg3[%c0_3, %c0_4] : memref<62x32xf32, #tpu.memory_space<vmem>>, vector<62x32xf32>
    %cst = arith.constant dense<0.000000e+00> : vector<8x32xf32>
    %13 = tpu.matmul %11, %12, %cst {dimension_numbers = #tpu.dot_dimension_numbers<[1], [0], [0], [1], [0, 0, 1, 1], [], []>} : vector<8x62xf32>, vector<62x32xf32>, vector<8x32xf32> -> vector<8x32xf32>
    %14 = tpu.iota {dimensions = array<i32: 1>} : vector<1x128xi32>
    %c32_i32 = arith.constant 32 : i32
    %c0_i32 = arith.constant 0 : i32
    %15 = arith.cmpi eq, %c32_i32, %c0_i32 : i32
    %c1_i32 = arith.constant 1 : i32
    %16 = arith.select %15, %c1_i32, %c32_i32 : i32
    %17 = vector.broadcast %16 : i32 to vector<1x128xi32>
    %18 = arith.remsi %14, %17 : vector<1x128xi32>
    %c0_i32_5 = arith.constant 0 : i32
    %19 = vector.broadcast %c0_i32_5 : i32 to vector<1x128xi32>
    %20 = arith.cmpi ne, %18, %19 : vector<1x128xi32>
    %c0_i32_6 = arith.constant 0 : i32
    %21 = vector.broadcast %c0_i32_6 : i32 to vector<1x128xi32>
    %22 = arith.cmpi slt, %18, %21 : vector<1x128xi32>
    %c0_i32_7 = arith.constant 0 : i32
    %23 = arith.cmpi slt, %16, %c0_i32_7 : i32
    %24 = vector.broadcast %23 : i1 to vector<1x128xi1>
    %25 = vector.broadcast %24 : vector<1x128xi1> to vector<1x128xi1>
    %26 = arith.xori %22, %25 : vector<1x128xi1>
    %27 = arith.andi %26, %20 : vector<1x128xi1>
    %28 = vector.broadcast %16 : i32 to vector<1x128xi32>
    %29 = arith.addi %18, %28 : vector<1x128xi32>
    %30 = arith.select %27, %29, %18 : vector<1x128xi1>, vector<1x128xi32>
    %c16_i32 = arith.constant 16 : i32
    %31 = vector.broadcast %c16_i32 : i32 to vector<1x128xi32>
    %32 = arith.cmpi slt, %30, %31 : vector<1x128xi32>
    %33 = tpu.iota {dimensions = array<i32: 1>} : vector<1x32xi32>
    %c16_i32_8 = arith.constant 16 : i32
    %34 = vector.broadcast %c16_i32_8 : i32 to vector<1x32xi32>
    %35 = arith.cmpi slt, %33, %34 : vector<1x32xi32>
    %c0_9 = arith.constant 0 : index
    %c0_10 = arith.constant 0 : index
    %36 = vector.load %arg4[%c0_9, %c0_10] : memref<32x128xf32, #tpu.memory_space<vmem>>, vector<32x128xf32>
    %c0_11 = arith.constant 0 : index
    %c0_12 = arith.constant 0 : index
    %37 = vector.load %arg5[%c0_11, %c0_12] : memref<32x128xf32, #tpu.memory_space<vmem>>, vector<32x128xf32>
    %c0_13 = arith.constant 0 : index
    %c0_14 = arith.constant 0 : index
    %38 = vector.load %arg6[%c0_13, %c0_14] : memref<1x128xf32, #tpu.memory_space<vmem>>, vector<1x128xf32>
    %cst_15 = arith.constant dense<0.000000e+00> : vector<8x128xf32>
    %39 = tpu.matmul %13, %36, %cst_15 {dimension_numbers = #tpu.dot_dimension_numbers<[1], [0], [0], [1], [0, 0, 1, 1], [], []>} : vector<8x32xf32>, vector<32x128xf32>, vector<8x128xf32> -> vector<8x128xf32>
    %40 = vector.broadcast %38 : vector<1x128xf32> to vector<8x128xf32>
    %41 = arith.addf %39, %40 : vector<8x128xf32>
    %cst_16 = arith.constant 0.000000e+00 : f32
    %42 = vector.broadcast %cst_16 : f32 to vector<1x32xf32>
    %cst_17 = arith.constant 0.000000e+00 : f32
    %43 = vector.broadcast %cst_17 : f32 to vector<1x32xf32>
    %44 = vector.extract_strided_slice %41 {offsets = [0, 0], sizes = [1, 128], strides = [1, 1]} : vector<8x128xf32> to vector<1x128xf32>
    %45 = vector.extract_strided_slice %41 {offsets = [7, 0], sizes = [1, 128], strides = [1, 1]} : vector<8x128xf32> to vector<1x128xf32>
    %46 = arith.select %32, %44, %45 : vector<1x128xi1>, vector<1x128xf32>
    %cst_18 = arith.constant dense<0.000000e+00> : vector<1x128xf32>
    %47 = tpu.matmul %42, %37, %cst_18 {dimension_numbers = #tpu.dot_dimension_numbers<[1], [0], [0], [1], [0, 0, 1, 1], [], []>} : vector<1x32xf32>, vector<32x128xf32>, vector<1x128xf32> -> vector<1x128xf32>
    %48 = arith.addf %46, %47 : vector<1x128xf32>
    %49 = vector.extract_strided_slice %48 {offsets = [0, 0], sizes = [1, 96], strides = [1, 1]} : vector<1x128xf32> to vector<1x96xf32>
    %50 = arith.negf %49 : vector<1x96xf32>
    %51 = math.exp %50 : vector<1x96xf32>
    %cst_19 = arith.constant 1.000000e+00 : f32
    %52 = vector.broadcast %cst_19 : f32 to vector<1x96xf32>
    %53 = arith.addf %52, %51 : vector<1x96xf32>
    %54 = arith.divf %52, %53 : vector<1x96xf32>
    %55 = vector.extract_strided_slice %54 {offsets = [0, 0], sizes = [1, 32], strides = [1, 1]} : vector<1x96xf32> to vector<1x32xf32>
    %56 = vector.extract_strided_slice %54 {offsets = [0, 32], sizes = [1, 32], strides = [1, 1]} : vector<1x96xf32> to vector<1x32xf32>
    %57 = vector.extract_strided_slice %54 {offsets = [0, 64], sizes = [1, 32], strides = [1, 1]} : vector<1x96xf32> to vector<1x32xf32>
    %58 = vector.extract_strided_slice %48 {offsets = [0, 96], sizes = [1, 32], strides = [1, 1]} : vector<1x128xf32> to vector<1x32xf32>
    %59 = math.tanh %58 : vector<1x32xf32>
    %60 = arith.mulf %56, %43 : vector<1x32xf32>
    %61 = arith.mulf %55, %59 : vector<1x32xf32>
    %62 = arith.addf %60, %61 : vector<1x32xf32>
    %63 = math.tanh %62 : vector<1x32xf32>
    %64 = arith.mulf %57, %63 : vector<1x32xf32>
    %65 = vector.extract_strided_slice %41 {offsets = [1, 0], sizes = [1, 128], strides = [1, 1]} : vector<8x128xf32> to vector<1x128xf32>
    %66 = vector.extract_strided_slice %41 {offsets = [6, 0], sizes = [1, 128], strides = [1, 1]} : vector<8x128xf32> to vector<1x128xf32>
    %67 = arith.select %32, %65, %66 : vector<1x128xi1>, vector<1x128xf32>
    %cst_20 = arith.constant dense<0.000000e+00> : vector<1x128xf32>
    %68 = tpu.matmul %64, %37, %cst_20 {dimension_numbers = #tpu.dot_dimension_numbers<[1], [0], [0], [1], [0, 0, 1, 1], [], []>} : vector<1x32xf32>, vector<32x128xf32>, vector<1x128xf32> -> vector<1x128xf32>
    %69 = arith.addf %67, %68 : vector<1x128xf32>
    %70 = vector.extract_strided_slice %69 {offsets = [0, 0], sizes = [1, 96], strides = [1, 1]} : vector<1x128xf32> to vector<1x96xf32>
    %71 = arith.negf %70 : vector<1x96xf32>
    %72 = math.exp %71 : vector<1x96xf32>
    %cst_21 = arith.constant 1.000000e+00 : f32
    %73 = vector.broadcast %cst_21 : f32 to vector<1x96xf32>
    %74 = arith.addf %73, %72 : vector<1x96xf32>
    %75 = arith.divf %73, %74 : vector<1x96xf32>
    %76 = vector.extract_strided_slice %75 {offsets = [0, 0], sizes = [1, 32], strides = [1, 1]} : vector<1x96xf32> to vector<1x32xf32>
    %77 = vector.extract_strided_slice %75 {offsets = [0, 32], sizes = [1, 32], strides = [1, 1]} : vector<1x96xf32> to vector<1x32xf32>
    %78 = vector.extract_strided_slice %75 {offsets = [0, 64], sizes = [1, 32], strides = [1, 1]} : vector<1x96xf32> to vector<1x32xf32>
    %79 = vector.extract_strided_slice %69 {offsets = [0, 96], sizes = [1, 32], strides = [1, 1]} : vector<1x128xf32> to vector<1x32xf32>
    %80 = math.tanh %79 : vector<1x32xf32>
    %81 = arith.mulf %77, %62 : vector<1x32xf32>
    %82 = arith.mulf %76, %80 : vector<1x32xf32>
    %83 = arith.addf %81, %82 : vector<1x32xf32>
    %84 = math.tanh %83 : vector<1x32xf32>
    %85 = arith.mulf %78, %84 : vector<1x32xf32>
    %86 = vector.extract_strided_slice %41 {offsets = [2, 0], sizes = [1, 128], strides = [1, 1]} : vector<8x128xf32> to vector<1x128xf32>
    %87 = vector.extract_strided_slice %41 {offsets = [5, 0], sizes = [1, 128], strides = [1, 1]} : vector<8x128xf32> to vector<1x128xf32>
    %88 = arith.select %32, %86, %87 : vector<1x128xi1>, vector<1x128xf32>
    %cst_22 = arith.constant dense<0.000000e+00> : vector<1x128xf32>
    %89 = tpu.matmul %85, %37, %cst_22 {dimension_numbers = #tpu.dot_dimension_numbers<[1], [0], [0], [1], [0, 0, 1, 1], [], []>} : vector<1x32xf32>, vector<32x128xf32>, vector<1x128xf32> -> vector<1x128xf32>
    %90 = arith.addf %88, %89 : vector<1x128xf32>
    %91 = vector.extract_strided_slice %90 {offsets = [0, 0], sizes = [1, 96], strides = [1, 1]} : vector<1x128xf32> to vector<1x96xf32>
    %92 = arith.negf %91 : vector<1x96xf32>
    %93 = math.exp %92 : vector<1x96xf32>
    %cst_23 = arith.constant 1.000000e+00 : f32
    %94 = vector.broadcast %cst_23 : f32 to vector<1x96xf32>
    %95 = arith.addf %94, %93 : vector<1x96xf32>
    %96 = arith.divf %94, %95 : vector<1x96xf32>
    %97 = vector.extract_strided_slice %96 {offsets = [0, 0], sizes = [1, 32], strides = [1, 1]} : vector<1x96xf32> to vector<1x32xf32>
    %98 = vector.extract_strided_slice %96 {offsets = [0, 32], sizes = [1, 32], strides = [1, 1]} : vector<1x96xf32> to vector<1x32xf32>
    %99 = vector.extract_strided_slice %96 {offsets = [0, 64], sizes = [1, 32], strides = [1, 1]} : vector<1x96xf32> to vector<1x32xf32>
    %100 = vector.extract_strided_slice %90 {offsets = [0, 96], sizes = [1, 32], strides = [1, 1]} : vector<1x128xf32> to vector<1x32xf32>
    %101 = math.tanh %100 : vector<1x32xf32>
    %102 = arith.mulf %98, %83 : vector<1x32xf32>
    %103 = arith.mulf %97, %101 : vector<1x32xf32>
    %104 = arith.addf %102, %103 : vector<1x32xf32>
    %105 = math.tanh %104 : vector<1x32xf32>
    %106 = arith.mulf %99, %105 : vector<1x32xf32>
    %107 = vector.extract_strided_slice %41 {offsets = [3, 0], sizes = [1, 128], strides = [1, 1]} : vector<8x128xf32> to vector<1x128xf32>
    %108 = vector.extract_strided_slice %41 {offsets = [4, 0], sizes = [1, 128], strides = [1, 1]} : vector<8x128xf32> to vector<1x128xf32>
    %109 = arith.select %32, %107, %108 : vector<1x128xi1>, vector<1x128xf32>
    %cst_24 = arith.constant dense<0.000000e+00> : vector<1x128xf32>
    %110 = tpu.matmul %106, %37, %cst_24 {dimension_numbers = #tpu.dot_dimension_numbers<[1], [0], [0], [1], [0, 0, 1, 1], [], []>} : vector<1x32xf32>, vector<32x128xf32>, vector<1x128xf32> -> vector<1x128xf32>
    %111 = arith.addf %109, %110 : vector<1x128xf32>
    %112 = vector.extract_strided_slice %111 {offsets = [0, 0], sizes = [1, 96], strides = [1, 1]} : vector<1x128xf32> to vector<1x96xf32>
    %113 = arith.negf %112 : vector<1x96xf32>
    %114 = math.exp %113 : vector<1x96xf32>
    %cst_25 = arith.constant 1.000000e+00 : f32
    %115 = vector.broadcast %cst_25 : f32 to vector<1x96xf32>
    %116 = arith.addf %115, %114 : vector<1x96xf32>
    %117 = arith.divf %115, %116 : vector<1x96xf32>
    %118 = vector.extract_strided_slice %117 {offsets = [0, 0], sizes = [1, 32], strides = [1, 1]} : vector<1x96xf32> to vector<1x32xf32>
    %119 = vector.extract_strided_slice %117 {offsets = [0, 32], sizes = [1, 32], strides = [1, 1]} : vector<1x96xf32> to vector<1x32xf32>
    %120 = vector.extract_strided_slice %117 {offsets = [0, 64], sizes = [1, 32], strides = [1, 1]} : vector<1x96xf32> to vector<1x32xf32>
    %121 = vector.extract_strided_slice %111 {offsets = [0, 96], sizes = [1, 32], strides = [1, 1]} : vector<1x128xf32> to vector<1x32xf32>
    %122 = math.tanh %121 : vector<1x32xf32>
    %123 = arith.mulf %119, %104 : vector<1x32xf32>
    %124 = arith.mulf %118, %122 : vector<1x32xf32>
    %125 = arith.addf %123, %124 : vector<1x32xf32>
    %126 = math.tanh %125 : vector<1x32xf32>
    %127 = arith.mulf %120, %126 : vector<1x32xf32>
    %128 = vector.extract_strided_slice %41 {offsets = [4, 0], sizes = [1, 128], strides = [1, 1]} : vector<8x128xf32> to vector<1x128xf32>
    %129 = vector.extract_strided_slice %41 {offsets = [3, 0], sizes = [1, 128], strides = [1, 1]} : vector<8x128xf32> to vector<1x128xf32>
    %130 = arith.select %32, %128, %129 : vector<1x128xi1>, vector<1x128xf32>
    %cst_26 = arith.constant dense<0.000000e+00> : vector<1x128xf32>
    %131 = tpu.matmul %127, %37, %cst_26 {dimension_numbers = #tpu.dot_dimension_numbers<[1], [0], [0], [1], [0, 0, 1, 1], [], []>} : vector<1x32xf32>, vector<32x128xf32>, vector<1x128xf32> -> vector<1x128xf32>
    %132 = arith.addf %130, %131 : vector<1x128xf32>
    %133 = vector.extract_strided_slice %132 {offsets = [0, 0], sizes = [1, 96], strides = [1, 1]} : vector<1x128xf32> to vector<1x96xf32>
    %134 = arith.negf %133 : vector<1x96xf32>
    %135 = math.exp %134 : vector<1x96xf32>
    %cst_27 = arith.constant 1.000000e+00 : f32
    %136 = vector.broadcast %cst_27 : f32 to vector<1x96xf32>
    %137 = arith.addf %136, %135 : vector<1x96xf32>
    %138 = arith.divf %136, %137 : vector<1x96xf32>
    %139 = vector.extract_strided_slice %138 {offsets = [0, 0], sizes = [1, 32], strides = [1, 1]} : vector<1x96xf32> to vector<1x32xf32>
    %140 = vector.extract_strided_slice %138 {offsets = [0, 32], sizes = [1, 32], strides = [1, 1]} : vector<1x96xf32> to vector<1x32xf32>
    %141 = vector.extract_strided_slice %138 {offsets = [0, 64], sizes = [1, 32], strides = [1, 1]} : vector<1x96xf32> to vector<1x32xf32>
    %142 = vector.extract_strided_slice %132 {offsets = [0, 96], sizes = [1, 32], strides = [1, 1]} : vector<1x128xf32> to vector<1x32xf32>
    %143 = math.tanh %142 : vector<1x32xf32>
    %144 = arith.mulf %140, %125 : vector<1x32xf32>
    %145 = arith.mulf %139, %143 : vector<1x32xf32>
    %146 = arith.addf %144, %145 : vector<1x32xf32>
    %147 = math.tanh %146 : vector<1x32xf32>
    %148 = arith.mulf %141, %147 : vector<1x32xf32>
    %149 = vector.extract_strided_slice %41 {offsets = [5, 0], sizes = [1, 128], strides = [1, 1]} : vector<8x128xf32> to vector<1x128xf32>
    %150 = vector.extract_strided_slice %41 {offsets = [2, 0], sizes = [1, 128], strides = [1, 1]} : vector<8x128xf32> to vector<1x128xf32>
    %151 = arith.select %32, %149, %150 : vector<1x128xi1>, vector<1x128xf32>
    %cst_28 = arith.constant dense<0.000000e+00> : vector<1x128xf32>
    %152 = tpu.matmul %148, %37, %cst_28 {dimension_numbers = #tpu.dot_dimension_numbers<[1], [0], [0], [1], [0, 0, 1, 1], [], []>} : vector<1x32xf32>, vector<32x128xf32>, vector<1x128xf32> -> vector<1x128xf32>
    %153 = arith.addf %151, %152 : vector<1x128xf32>
    %154 = vector.extract_strided_slice %153 {offsets = [0, 0], sizes = [1, 96], strides = [1, 1]} : vector<1x128xf32> to vector<1x96xf32>
    %155 = arith.negf %154 : vector<1x96xf32>
    %156 = math.exp %155 : vector<1x96xf32>
    %cst_29 = arith.constant 1.000000e+00 : f32
    %157 = vector.broadcast %cst_29 : f32 to vector<1x96xf32>
    %158 = arith.addf %157, %156 : vector<1x96xf32>
    %159 = arith.divf %157, %158 : vector<1x96xf32>
    %160 = vector.extract_strided_slice %159 {offsets = [0, 0], sizes = [1, 32], strides = [1, 1]} : vector<1x96xf32> to vector<1x32xf32>
    %161 = vector.extract_strided_slice %159 {offsets = [0, 32], sizes = [1, 32], strides = [1, 1]} : vector<1x96xf32> to vector<1x32xf32>
    %162 = vector.extract_strided_slice %159 {offsets = [0, 64], sizes = [1, 32], strides = [1, 1]} : vector<1x96xf32> to vector<1x32xf32>
    %163 = vector.extract_strided_slice %153 {offsets = [0, 96], sizes = [1, 32], strides = [1, 1]} : vector<1x128xf32> to vector<1x32xf32>
    %164 = math.tanh %163 : vector<1x32xf32>
    %165 = arith.mulf %161, %146 : vector<1x32xf32>
    %166 = arith.mulf %160, %164 : vector<1x32xf32>
    %167 = arith.addf %165, %166 : vector<1x32xf32>
    %168 = math.tanh %167 : vector<1x32xf32>
    %169 = arith.mulf %162, %168 : vector<1x32xf32>
    %170 = vector.extract_strided_slice %41 {offsets = [6, 0], sizes = [1, 128], strides = [1, 1]} : vector<8x128xf32> to vector<1x128xf32>
    %171 = vector.extract_strided_slice %41 {offsets = [1, 0], sizes = [1, 128], strides = [1, 1]} : vector<8x128xf32> to vector<1x128xf32>
    %172 = arith.select %32, %170, %171 : vector<1x128xi1>, vector<1x128xf32>
    %cst_30 = arith.constant dense<0.000000e+00> : vector<1x128xf32>
    %173 = tpu.matmul %169, %37, %cst_30 {dimension_numbers = #tpu.dot_dimension_numbers<[1], [0], [0], [1], [0, 0, 1, 1], [], []>} : vector<1x32xf32>, vector<32x128xf32>, vector<1x128xf32> -> vector<1x128xf32>
    %174 = arith.addf %172, %173 : vector<1x128xf32>
    %175 = vector.extract_strided_slice %174 {offsets = [0, 0], sizes = [1, 96], strides = [1, 1]} : vector<1x128xf32> to vector<1x96xf32>
    %176 = arith.negf %175 : vector<1x96xf32>
    %177 = math.exp %176 : vector<1x96xf32>
    %cst_31 = arith.constant 1.000000e+00 : f32
    %178 = vector.broadcast %cst_31 : f32 to vector<1x96xf32>
    %179 = arith.addf %178, %177 : vector<1x96xf32>
    %180 = arith.divf %178, %179 : vector<1x96xf32>
    %181 = vector.extract_strided_slice %180 {offsets = [0, 0], sizes = [1, 32], strides = [1, 1]} : vector<1x96xf32> to vector<1x32xf32>
    %182 = vector.extract_strided_slice %180 {offsets = [0, 32], sizes = [1, 32], strides = [1, 1]} : vector<1x96xf32> to vector<1x32xf32>
    %183 = vector.extract_strided_slice %180 {offsets = [0, 64], sizes = [1, 32], strides = [1, 1]} : vector<1x96xf32> to vector<1x32xf32>
    %184 = vector.extract_strided_slice %174 {offsets = [0, 96], sizes = [1, 32], strides = [1, 1]} : vector<1x128xf32> to vector<1x32xf32>
    %185 = math.tanh %184 : vector<1x32xf32>
    %186 = arith.mulf %182, %167 : vector<1x32xf32>
    %187 = arith.mulf %181, %185 : vector<1x32xf32>
    %188 = arith.addf %186, %187 : vector<1x32xf32>
    %189 = math.tanh %188 : vector<1x32xf32>
    %190 = arith.mulf %183, %189 : vector<1x32xf32>
    %191 = vector.extract_strided_slice %41 {offsets = [7, 0], sizes = [1, 128], strides = [1, 1]} : vector<8x128xf32> to vector<1x128xf32>
    %192 = vector.extract_strided_slice %41 {offsets = [0, 0], sizes = [1, 128], strides = [1, 1]} : vector<8x128xf32> to vector<1x128xf32>
    %193 = arith.select %32, %191, %192 : vector<1x128xi1>, vector<1x128xf32>
    %cst_32 = arith.constant dense<0.000000e+00> : vector<1x128xf32>
    %194 = tpu.matmul %190, %37, %cst_32 {dimension_numbers = #tpu.dot_dimension_numbers<[1], [0], [0], [1], [0, 0, 1, 1], [], []>} : vector<1x32xf32>, vector<32x128xf32>, vector<1x128xf32> -> vector<1x128xf32>
    %195 = arith.addf %193, %194 : vector<1x128xf32>
    %196 = vector.extract_strided_slice %195 {offsets = [0, 0], sizes = [1, 96], strides = [1, 1]} : vector<1x128xf32> to vector<1x96xf32>
    %197 = arith.negf %196 : vector<1x96xf32>
    %198 = math.exp %197 : vector<1x96xf32>
    %cst_33 = arith.constant 1.000000e+00 : f32
    %199 = vector.broadcast %cst_33 : f32 to vector<1x96xf32>
    %200 = arith.addf %199, %198 : vector<1x96xf32>
    %201 = arith.divf %199, %200 : vector<1x96xf32>
    %202 = vector.extract_strided_slice %201 {offsets = [0, 0], sizes = [1, 32], strides = [1, 1]} : vector<1x96xf32> to vector<1x32xf32>
    %203 = vector.extract_strided_slice %201 {offsets = [0, 32], sizes = [1, 32], strides = [1, 1]} : vector<1x96xf32> to vector<1x32xf32>
    %204 = vector.extract_strided_slice %201 {offsets = [0, 64], sizes = [1, 32], strides = [1, 1]} : vector<1x96xf32> to vector<1x32xf32>
    %205 = vector.extract_strided_slice %195 {offsets = [0, 96], sizes = [1, 32], strides = [1, 1]} : vector<1x128xf32> to vector<1x32xf32>
    %206 = math.tanh %205 : vector<1x32xf32>
    %207 = arith.mulf %203, %188 : vector<1x32xf32>
    %208 = arith.mulf %202, %206 : vector<1x32xf32>
    %209 = arith.addf %207, %208 : vector<1x32xf32>
    %210 = math.tanh %209 : vector<1x32xf32>
    %211 = arith.mulf %204, %210 : vector<1x32xf32>
    %212 = arith.select %35, %64, %211 : vector<1x32xi1>, vector<1x32xf32>
    %213 = arith.select %35, %85, %190 : vector<1x32xi1>, vector<1x32xf32>
    %214 = arith.select %35, %106, %169 : vector<1x32xi1>, vector<1x32xf32>
    %215 = arith.select %35, %127, %148 : vector<1x32xi1>, vector<1x32xf32>
    %216 = arith.select %35, %148, %127 : vector<1x32xi1>, vector<1x32xf32>
    %217 = arith.select %35, %169, %106 : vector<1x32xi1>, vector<1x32xf32>
    %218 = arith.select %35, %190, %85 : vector<1x32xi1>, vector<1x32xf32>
    %219 = arith.select %35, %211, %64 : vector<1x32xi1>, vector<1x32xf32>
    %220 = tpu.concatenate %212, %213, %214, %215, %216, %217, %218, %219 in 0 : vector<1x32xf32>, vector<1x32xf32>, vector<1x32xf32>, vector<1x32xf32>, vector<1x32xf32>, vector<1x32xf32>, vector<1x32xf32>, vector<1x32xf32> -> vector<8x32xf32>
    %c0_34 = arith.constant 0 : index
    %c0_35 = arith.constant 0 : index
    %221 = vector.load %arg7[%c0_34, %c0_35] : memref<32x128xf32, #tpu.memory_space<vmem>>, vector<32x128xf32>
    %c0_36 = arith.constant 0 : index
    %c0_37 = arith.constant 0 : index
    %222 = vector.load %arg8[%c0_36, %c0_37] : memref<32x128xf32, #tpu.memory_space<vmem>>, vector<32x128xf32>
    %c0_38 = arith.constant 0 : index
    %c0_39 = arith.constant 0 : index
    %223 = vector.load %arg9[%c0_38, %c0_39] : memref<1x128xf32, #tpu.memory_space<vmem>>, vector<1x128xf32>
    %cst_40 = arith.constant dense<0.000000e+00> : vector<8x128xf32>
    %224 = tpu.matmul %220, %221, %cst_40 {dimension_numbers = #tpu.dot_dimension_numbers<[1], [0], [0], [1], [0, 0, 1, 1], [], []>} : vector<8x32xf32>, vector<32x128xf32>, vector<8x128xf32> -> vector<8x128xf32>
    %225 = vector.broadcast %223 : vector<1x128xf32> to vector<8x128xf32>
    %226 = arith.addf %224, %225 : vector<8x128xf32>
    %cst_41 = arith.constant 0.000000e+00 : f32
    %227 = vector.broadcast %cst_41 : f32 to vector<1x32xf32>
    %cst_42 = arith.constant 0.000000e+00 : f32
    %228 = vector.broadcast %cst_42 : f32 to vector<1x32xf32>
    %229 = vector.extract_strided_slice %226 {offsets = [0, 0], sizes = [1, 128], strides = [1, 1]} : vector<8x128xf32> to vector<1x128xf32>
    %230 = vector.extract_strided_slice %226 {offsets = [7, 0], sizes = [1, 128], strides = [1, 1]} : vector<8x128xf32> to vector<1x128xf32>
    %231 = arith.select %32, %229, %230 : vector<1x128xi1>, vector<1x128xf32>
    %cst_43 = arith.constant dense<0.000000e+00> : vector<1x128xf32>
    %232 = tpu.matmul %227, %222, %cst_43 {dimension_numbers = #tpu.dot_dimension_numbers<[1], [0], [0], [1], [0, 0, 1, 1], [], []>} : vector<1x32xf32>, vector<32x128xf32>, vector<1x128xf32> -> vector<1x128xf32>
    %233 = arith.addf %231, %232 : vector<1x128xf32>
    %234 = vector.extract_strided_slice %233 {offsets = [0, 0], sizes = [1, 96], strides = [1, 1]} : vector<1x128xf32> to vector<1x96xf32>
    %235 = arith.negf %234 : vector<1x96xf32>
    %236 = math.exp %235 : vector<1x96xf32>
    %cst_44 = arith.constant 1.000000e+00 : f32
    %237 = vector.broadcast %cst_44 : f32 to vector<1x96xf32>
    %238 = arith.addf %237, %236 : vector<1x96xf32>
    %239 = arith.divf %237, %238 : vector<1x96xf32>
    %240 = vector.extract_strided_slice %239 {offsets = [0, 0], sizes = [1, 32], strides = [1, 1]} : vector<1x96xf32> to vector<1x32xf32>
    %241 = vector.extract_strided_slice %239 {offsets = [0, 32], sizes = [1, 32], strides = [1, 1]} : vector<1x96xf32> to vector<1x32xf32>
    %242 = vector.extract_strided_slice %239 {offsets = [0, 64], sizes = [1, 32], strides = [1, 1]} : vector<1x96xf32> to vector<1x32xf32>
    %243 = vector.extract_strided_slice %233 {offsets = [0, 96], sizes = [1, 32], strides = [1, 1]} : vector<1x128xf32> to vector<1x32xf32>
    %244 = math.tanh %243 : vector<1x32xf32>
    %245 = arith.mulf %241, %228 : vector<1x32xf32>
    %246 = arith.mulf %240, %244 : vector<1x32xf32>
    %247 = arith.addf %245, %246 : vector<1x32xf32>
    %248 = math.tanh %247 : vector<1x32xf32>
    %249 = arith.mulf %242, %248 : vector<1x32xf32>
    %250 = vector.extract_strided_slice %226 {offsets = [1, 0], sizes = [1, 128], strides = [1, 1]} : vector<8x128xf32> to vector<1x128xf32>
    %251 = vector.extract_strided_slice %226 {offsets = [6, 0], sizes = [1, 128], strides = [1, 1]} : vector<8x128xf32> to vector<1x128xf32>
    %252 = arith.select %32, %250, %251 : vector<1x128xi1>, vector<1x128xf32>
    %cst_45 = arith.constant dense<0.000000e+00> : vector<1x128xf32>
    %253 = tpu.matmul %249, %222, %cst_45 {dimension_numbers = #tpu.dot_dimension_numbers<[1], [0], [0], [1], [0, 0, 1, 1], [], []>} : vector<1x32xf32>, vector<32x128xf32>, vector<1x128xf32> -> vector<1x128xf32>
    %254 = arith.addf %252, %253 : vector<1x128xf32>
    %255 = vector.extract_strided_slice %254 {offsets = [0, 0], sizes = [1, 96], strides = [1, 1]} : vector<1x128xf32> to vector<1x96xf32>
    %256 = arith.negf %255 : vector<1x96xf32>
    %257 = math.exp %256 : vector<1x96xf32>
    %cst_46 = arith.constant 1.000000e+00 : f32
    %258 = vector.broadcast %cst_46 : f32 to vector<1x96xf32>
    %259 = arith.addf %258, %257 : vector<1x96xf32>
    %260 = arith.divf %258, %259 : vector<1x96xf32>
    %261 = vector.extract_strided_slice %260 {offsets = [0, 0], sizes = [1, 32], strides = [1, 1]} : vector<1x96xf32> to vector<1x32xf32>
    %262 = vector.extract_strided_slice %260 {offsets = [0, 32], sizes = [1, 32], strides = [1, 1]} : vector<1x96xf32> to vector<1x32xf32>
    %263 = vector.extract_strided_slice %260 {offsets = [0, 64], sizes = [1, 32], strides = [1, 1]} : vector<1x96xf32> to vector<1x32xf32>
    %264 = vector.extract_strided_slice %254 {offsets = [0, 96], sizes = [1, 32], strides = [1, 1]} : vector<1x128xf32> to vector<1x32xf32>
    %265 = math.tanh %264 : vector<1x32xf32>
    %266 = arith.mulf %262, %247 : vector<1x32xf32>
    %267 = arith.mulf %261, %265 : vector<1x32xf32>
    %268 = arith.addf %266, %267 : vector<1x32xf32>
    %269 = math.tanh %268 : vector<1x32xf32>
    %270 = arith.mulf %263, %269 : vector<1x32xf32>
    %271 = vector.extract_strided_slice %226 {offsets = [2, 0], sizes = [1, 128], strides = [1, 1]} : vector<8x128xf32> to vector<1x128xf32>
    %272 = vector.extract_strided_slice %226 {offsets = [5, 0], sizes = [1, 128], strides = [1, 1]} : vector<8x128xf32> to vector<1x128xf32>
    %273 = arith.select %32, %271, %272 : vector<1x128xi1>, vector<1x128xf32>
    %cst_47 = arith.constant dense<0.000000e+00> : vector<1x128xf32>
    %274 = tpu.matmul %270, %222, %cst_47 {dimension_numbers = #tpu.dot_dimension_numbers<[1], [0], [0], [1], [0, 0, 1, 1], [], []>} : vector<1x32xf32>, vector<32x128xf32>, vector<1x128xf32> -> vector<1x128xf32>
    %275 = arith.addf %273, %274 : vector<1x128xf32>
    %276 = vector.extract_strided_slice %275 {offsets = [0, 0], sizes = [1, 96], strides = [1, 1]} : vector<1x128xf32> to vector<1x96xf32>
    %277 = arith.negf %276 : vector<1x96xf32>
    %278 = math.exp %277 : vector<1x96xf32>
    %cst_48 = arith.constant 1.000000e+00 : f32
    %279 = vector.broadcast %cst_48 : f32 to vector<1x96xf32>
    %280 = arith.addf %279, %278 : vector<1x96xf32>
    %281 = arith.divf %279, %280 : vector<1x96xf32>
    %282 = vector.extract_strided_slice %281 {offsets = [0, 0], sizes = [1, 32], strides = [1, 1]} : vector<1x96xf32> to vector<1x32xf32>
    %283 = vector.extract_strided_slice %281 {offsets = [0, 32], sizes = [1, 32], strides = [1, 1]} : vector<1x96xf32> to vector<1x32xf32>
    %284 = vector.extract_strided_slice %281 {offsets = [0, 64], sizes = [1, 32], strides = [1, 1]} : vector<1x96xf32> to vector<1x32xf32>
    %285 = vector.extract_strided_slice %275 {offsets = [0, 96], sizes = [1, 32], strides = [1, 1]} : vector<1x128xf32> to vector<1x32xf32>
    %286 = math.tanh %285 : vector<1x32xf32>
    %287 = arith.mulf %283, %268 : vector<1x32xf32>
    %288 = arith.mulf %282, %286 : vector<1x32xf32>
    %289 = arith.addf %287, %288 : vector<1x32xf32>
    %290 = math.tanh %289 : vector<1x32xf32>
    %291 = arith.mulf %284, %290 : vector<1x32xf32>
    %292 = vector.extract_strided_slice %226 {offsets = [3, 0], sizes = [1, 128], strides = [1, 1]} : vector<8x128xf32> to vector<1x128xf32>
    %293 = vector.extract_strided_slice %226 {offsets = [4, 0], sizes = [1, 128], strides = [1, 1]} : vector<8x128xf32> to vector<1x128xf32>
    %294 = arith.select %32, %292, %293 : vector<1x128xi1>, vector<1x128xf32>
    %cst_49 = arith.constant dense<0.000000e+00> : vector<1x128xf32>
    %295 = tpu.matmul %291, %222, %cst_49 {dimension_numbers = #tpu.dot_dimension_numbers<[1], [0], [0], [1], [0, 0, 1, 1], [], []>} : vector<1x32xf32>, vector<32x128xf32>, vector<1x128xf32> -> vector<1x128xf32>
    %296 = arith.addf %294, %295 : vector<1x128xf32>
    %297 = vector.extract_strided_slice %296 {offsets = [0, 0], sizes = [1, 96], strides = [1, 1]} : vector<1x128xf32> to vector<1x96xf32>
    %298 = arith.negf %297 : vector<1x96xf32>
    %299 = math.exp %298 : vector<1x96xf32>
    %cst_50 = arith.constant 1.000000e+00 : f32
    %300 = vector.broadcast %cst_50 : f32 to vector<1x96xf32>
    %301 = arith.addf %300, %299 : vector<1x96xf32>
    %302 = arith.divf %300, %301 : vector<1x96xf32>
    %303 = vector.extract_strided_slice %302 {offsets = [0, 0], sizes = [1, 32], strides = [1, 1]} : vector<1x96xf32> to vector<1x32xf32>
    %304 = vector.extract_strided_slice %302 {offsets = [0, 32], sizes = [1, 32], strides = [1, 1]} : vector<1x96xf32> to vector<1x32xf32>
    %305 = vector.extract_strided_slice %302 {offsets = [0, 64], sizes = [1, 32], strides = [1, 1]} : vector<1x96xf32> to vector<1x32xf32>
    %306 = vector.extract_strided_slice %296 {offsets = [0, 96], sizes = [1, 32], strides = [1, 1]} : vector<1x128xf32> to vector<1x32xf32>
    %307 = math.tanh %306 : vector<1x32xf32>
    %308 = arith.mulf %304, %289 : vector<1x32xf32>
    %309 = arith.mulf %303, %307 : vector<1x32xf32>
    %310 = arith.addf %308, %309 : vector<1x32xf32>
    %311 = math.tanh %310 : vector<1x32xf32>
    %312 = arith.mulf %305, %311 : vector<1x32xf32>
    %313 = vector.extract_strided_slice %226 {offsets = [4, 0], sizes = [1, 128], strides = [1, 1]} : vector<8x128xf32> to vector<1x128xf32>
    %314 = vector.extract_strided_slice %226 {offsets = [3, 0], sizes = [1, 128], strides = [1, 1]} : vector<8x128xf32> to vector<1x128xf32>
    %315 = arith.select %32, %313, %314 : vector<1x128xi1>, vector<1x128xf32>
    %cst_51 = arith.constant dense<0.000000e+00> : vector<1x128xf32>
    %316 = tpu.matmul %312, %222, %cst_51 {dimension_numbers = #tpu.dot_dimension_numbers<[1], [0], [0], [1], [0, 0, 1, 1], [], []>} : vector<1x32xf32>, vector<32x128xf32>, vector<1x128xf32> -> vector<1x128xf32>
    %317 = arith.addf %315, %316 : vector<1x128xf32>
    %318 = vector.extract_strided_slice %317 {offsets = [0, 0], sizes = [1, 96], strides = [1, 1]} : vector<1x128xf32> to vector<1x96xf32>
    %319 = arith.negf %318 : vector<1x96xf32>
    %320 = math.exp %319 : vector<1x96xf32>
    %cst_52 = arith.constant 1.000000e+00 : f32
    %321 = vector.broadcast %cst_52 : f32 to vector<1x96xf32>
    %322 = arith.addf %321, %320 : vector<1x96xf32>
    %323 = arith.divf %321, %322 : vector<1x96xf32>
    %324 = vector.extract_strided_slice %323 {offsets = [0, 0], sizes = [1, 32], strides = [1, 1]} : vector<1x96xf32> to vector<1x32xf32>
    %325 = vector.extract_strided_slice %323 {offsets = [0, 32], sizes = [1, 32], strides = [1, 1]} : vector<1x96xf32> to vector<1x32xf32>
    %326 = vector.extract_strided_slice %323 {offsets = [0, 64], sizes = [1, 32], strides = [1, 1]} : vector<1x96xf32> to vector<1x32xf32>
    %327 = vector.extract_strided_slice %317 {offsets = [0, 96], sizes = [1, 32], strides = [1, 1]} : vector<1x128xf32> to vector<1x32xf32>
    %328 = math.tanh %327 : vector<1x32xf32>
    %329 = arith.mulf %325, %310 : vector<1x32xf32>
    %330 = arith.mulf %324, %328 : vector<1x32xf32>
    %331 = arith.addf %329, %330 : vector<1x32xf32>
    %332 = math.tanh %331 : vector<1x32xf32>
    %333 = arith.mulf %326, %332 : vector<1x32xf32>
    %334 = vector.extract_strided_slice %226 {offsets = [5, 0], sizes = [1, 128], strides = [1, 1]} : vector<8x128xf32> to vector<1x128xf32>
    %335 = vector.extract_strided_slice %226 {offsets = [2, 0], sizes = [1, 128], strides = [1, 1]} : vector<8x128xf32> to vector<1x128xf32>
    %336 = arith.select %32, %334, %335 : vector<1x128xi1>, vector<1x128xf32>
    %cst_53 = arith.constant dense<0.000000e+00> : vector<1x128xf32>
    %337 = tpu.matmul %333, %222, %cst_53 {dimension_numbers = #tpu.dot_dimension_numbers<[1], [0], [0], [1], [0, 0, 1, 1], [], []>} : vector<1x32xf32>, vector<32x128xf32>, vector<1x128xf32> -> vector<1x128xf32>
    %338 = arith.addf %336, %337 : vector<1x128xf32>
    %339 = vector.extract_strided_slice %338 {offsets = [0, 0], sizes = [1, 96], strides = [1, 1]} : vector<1x128xf32> to vector<1x96xf32>
    %340 = arith.negf %339 : vector<1x96xf32>
    %341 = math.exp %340 : vector<1x96xf32>
    %cst_54 = arith.constant 1.000000e+00 : f32
    %342 = vector.broadcast %cst_54 : f32 to vector<1x96xf32>
    %343 = arith.addf %342, %341 : vector<1x96xf32>
    %344 = arith.divf %342, %343 : vector<1x96xf32>
    %345 = vector.extract_strided_slice %344 {offsets = [0, 0], sizes = [1, 32], strides = [1, 1]} : vector<1x96xf32> to vector<1x32xf32>
    %346 = vector.extract_strided_slice %344 {offsets = [0, 32], sizes = [1, 32], strides = [1, 1]} : vector<1x96xf32> to vector<1x32xf32>
    %347 = vector.extract_strided_slice %344 {offsets = [0, 64], sizes = [1, 32], strides = [1, 1]} : vector<1x96xf32> to vector<1x32xf32>
    %348 = vector.extract_strided_slice %338 {offsets = [0, 96], sizes = [1, 32], strides = [1, 1]} : vector<1x128xf32> to vector<1x32xf32>
    %349 = math.tanh %348 : vector<1x32xf32>
    %350 = arith.mulf %346, %331 : vector<1x32xf32>
    %351 = arith.mulf %345, %349 : vector<1x32xf32>
    %352 = arith.addf %350, %351 : vector<1x32xf32>
    %353 = math.tanh %352 : vector<1x32xf32>
    %354 = arith.mulf %347, %353 : vector<1x32xf32>
    %355 = vector.extract_strided_slice %226 {offsets = [6, 0], sizes = [1, 128], strides = [1, 1]} : vector<8x128xf32> to vector<1x128xf32>
    %356 = vector.extract_strided_slice %226 {offsets = [1, 0], sizes = [1, 128], strides = [1, 1]} : vector<8x128xf32> to vector<1x128xf32>
    %357 = arith.select %32, %355, %356 : vector<1x128xi1>, vector<1x128xf32>
    %cst_55 = arith.constant dense<0.000000e+00> : vector<1x128xf32>
    %358 = tpu.matmul %354, %222, %cst_55 {dimension_numbers = #tpu.dot_dimension_numbers<[1], [0], [0], [1], [0, 0, 1, 1], [], []>} : vector<1x32xf32>, vector<32x128xf32>, vector<1x128xf32> -> vector<1x128xf32>
    %359 = arith.addf %357, %358 : vector<1x128xf32>
    %360 = vector.extract_strided_slice %359 {offsets = [0, 0], sizes = [1, 96], strides = [1, 1]} : vector<1x128xf32> to vector<1x96xf32>
    %361 = arith.negf %360 : vector<1x96xf32>
    %362 = math.exp %361 : vector<1x96xf32>
    %cst_56 = arith.constant 1.000000e+00 : f32
    %363 = vector.broadcast %cst_56 : f32 to vector<1x96xf32>
    %364 = arith.addf %363, %362 : vector<1x96xf32>
    %365 = arith.divf %363, %364 : vector<1x96xf32>
    %366 = vector.extract_strided_slice %365 {offsets = [0, 0], sizes = [1, 32], strides = [1, 1]} : vector<1x96xf32> to vector<1x32xf32>
    %367 = vector.extract_strided_slice %365 {offsets = [0, 32], sizes = [1, 32], strides = [1, 1]} : vector<1x96xf32> to vector<1x32xf32>
    %368 = vector.extract_strided_slice %365 {offsets = [0, 64], sizes = [1, 32], strides = [1, 1]} : vector<1x96xf32> to vector<1x32xf32>
    %369 = vector.extract_strided_slice %359 {offsets = [0, 96], sizes = [1, 32], strides = [1, 1]} : vector<1x128xf32> to vector<1x32xf32>
    %370 = math.tanh %369 : vector<1x32xf32>
    %371 = arith.mulf %367, %352 : vector<1x32xf32>
    %372 = arith.mulf %366, %370 : vector<1x32xf32>
    %373 = arith.addf %371, %372 : vector<1x32xf32>
    %374 = math.tanh %373 : vector<1x32xf32>
    %375 = arith.mulf %368, %374 : vector<1x32xf32>
    %376 = vector.extract_strided_slice %226 {offsets = [7, 0], sizes = [1, 128], strides = [1, 1]} : vector<8x128xf32> to vector<1x128xf32>
    %377 = vector.extract_strided_slice %226 {offsets = [0, 0], sizes = [1, 128], strides = [1, 1]} : vector<8x128xf32> to vector<1x128xf32>
    %378 = arith.select %32, %376, %377 : vector<1x128xi1>, vector<1x128xf32>
    %cst_57 = arith.constant dense<0.000000e+00> : vector<1x128xf32>
    %379 = tpu.matmul %375, %222, %cst_57 {dimension_numbers = #tpu.dot_dimension_numbers<[1], [0], [0], [1], [0, 0, 1, 1], [], []>} : vector<1x32xf32>, vector<32x128xf32>, vector<1x128xf32> -> vector<1x128xf32>
    %380 = arith.addf %378, %379 : vector<1x128xf32>
    %381 = vector.extract_strided_slice %380 {offsets = [0, 0], sizes = [1, 96], strides = [1, 1]} : vector<1x128xf32> to vector<1x96xf32>
    %382 = arith.negf %381 : vector<1x96xf32>
    %383 = math.exp %382 : vector<1x96xf32>
    %cst_58 = arith.constant 1.000000e+00 : f32
    %384 = vector.broadcast %cst_58 : f32 to vector<1x96xf32>
    %385 = arith.addf %384, %383 : vector<1x96xf32>
    %386 = arith.divf %384, %385 : vector<1x96xf32>
    %387 = vector.extract_strided_slice %386 {offsets = [0, 0], sizes = [1, 32], strides = [1, 1]} : vector<1x96xf32> to vector<1x32xf32>
    %388 = vector.extract_strided_slice %386 {offsets = [0, 32], sizes = [1, 32], strides = [1, 1]} : vector<1x96xf32> to vector<1x32xf32>
    %389 = vector.extract_strided_slice %386 {offsets = [0, 64], sizes = [1, 32], strides = [1, 1]} : vector<1x96xf32> to vector<1x32xf32>
    %390 = vector.extract_strided_slice %380 {offsets = [0, 96], sizes = [1, 32], strides = [1, 1]} : vector<1x128xf32> to vector<1x32xf32>
    %391 = math.tanh %390 : vector<1x32xf32>
    %392 = arith.mulf %388, %373 : vector<1x32xf32>
    %393 = arith.mulf %387, %391 : vector<1x32xf32>
    %394 = arith.addf %392, %393 : vector<1x32xf32>
    %395 = math.tanh %394 : vector<1x32xf32>
    %396 = arith.mulf %389, %395 : vector<1x32xf32>
    %397 = arith.select %35, %249, %396 : vector<1x32xi1>, vector<1x32xf32>
    %398 = arith.select %35, %270, %375 : vector<1x32xi1>, vector<1x32xf32>
    %399 = arith.select %35, %291, %354 : vector<1x32xi1>, vector<1x32xf32>
    %400 = arith.select %35, %312, %333 : vector<1x32xi1>, vector<1x32xf32>
    %401 = arith.select %35, %333, %312 : vector<1x32xi1>, vector<1x32xf32>
    %402 = arith.select %35, %354, %291 : vector<1x32xi1>, vector<1x32xf32>
    %403 = arith.select %35, %375, %270 : vector<1x32xi1>, vector<1x32xf32>
    %404 = arith.select %35, %396, %249 : vector<1x32xi1>, vector<1x32xf32>
    %405 = tpu.concatenate %397, %398, %399, %400, %401, %402, %403, %404 in 0 : vector<1x32xf32>, vector<1x32xf32>, vector<1x32xf32>, vector<1x32xf32>, vector<1x32xf32>, vector<1x32xf32>, vector<1x32xf32>, vector<1x32xf32> -> vector<8x32xf32>
    %c0_59 = arith.constant 0 : index
    %c0_60 = arith.constant 0 : index
    %406 = vector.load %arg10[%c0_59, %c0_60] : memref<32x64xf32, #tpu.memory_space<vmem>>, vector<32x64xf32>
    %cst_61 = arith.constant dense<0.000000e+00> : vector<8x64xf32>
    %407 = tpu.matmul %405, %406, %cst_61 {dimension_numbers = #tpu.dot_dimension_numbers<[1], [0], [0], [1], [0, 0, 1, 1], [], []>} : vector<8x32xf32>, vector<32x64xf32>, vector<8x64xf32> -> vector<8x64xf32>
    %c0_62 = arith.constant 0 : index
    %c0_63 = arith.constant 0 : index
    %408 = vector.load %arg11[%c0_62, %c0_63] : memref<1x64xf32, #tpu.memory_space<vmem>>, vector<1x64xf32>
    %409 = vector.broadcast %408 : vector<1x64xf32> to vector<8x64xf32>
    %410 = arith.addf %407, %409 : vector<8x64xf32>
    %cst_64 = arith.constant 0.000000e+00 : f32
    %411 = vector.broadcast %cst_64 : f32 to vector<8x64xf32>
    %412 = arith.maximumf %410, %411 : vector<8x64xf32>
    %413 = vector.extract_strided_slice %412 {offsets = [0, 0], sizes = [8, 32], strides = [1, 1]} : vector<8x64xf32> to vector<8x32xf32>
    %414 = tpu.iota {dimensions = array<i32: 1>} : vector<2x8xi32>
    %c0_65 = arith.constant 0 : index
    %c0_66 = arith.constant 0 : index
    %415 = vector.load %arg2[%c0_65, %c0_66] : memref<2x1xi32, #tpu.memory_space<vmem>>, vector<2x1xi32>
    %416 = vector.broadcast %415 : vector<2x1xi32> to vector<2x8xi32>
    %417 = arith.cmpi eq, %414, %416 : vector<2x8xi32>
    %418 = arith.extui %417 : vector<2x8xi1> to vector<2x8xi32>
    %419 = arith.sitofp %418 : vector<2x8xi32> to vector<2x8xf32>
    %cst_67 = arith.constant dense<0.000000e+00> : vector<2x64xf32>
    %420 = tpu.matmul %419, %412, %cst_67 {dimension_numbers = #tpu.dot_dimension_numbers<[1], [0], [0], [1], [0, 0, 1, 1], [], []>} : vector<2x8xf32>, vector<8x64xf32>, vector<2x64xf32> -> vector<2x64xf32>
    %421 = vector.extract_strided_slice %420 {offsets = [0, 32], sizes = [2, 32], strides = [1, 1]} : vector<2x64xf32> to vector<2x32xf32>
    %c0_68 = arith.constant 0 : index
    %c0_69 = arith.constant 0 : index
    %422 = vector.load %arg12[%c0_68, %c0_69] : memref<32x264xf32, #tpu.memory_space<vmem>>, vector<32x264xf32>
    %cst_70 = arith.constant dense<0.000000e+00> : vector<8x264xf32>
    %423 = tpu.matmul %413, %422, %cst_70 {dimension_numbers = #tpu.dot_dimension_numbers<[1], [0], [0], [1], [0, 0, 1, 1], [], []>} : vector<8x32xf32>, vector<32x264xf32>, vector<8x264xf32> -> vector<8x264xf32>
    %c0_71 = arith.constant 0 : index
    %c0_72 = arith.constant 0 : index
    %424 = vector.load %arg13[%c0_71, %c0_72] : memref<1x264xf32, #tpu.memory_space<vmem>>, vector<1x264xf32>
    %425 = vector.broadcast %424 : vector<1x264xf32> to vector<8x264xf32>
    %426 = arith.addf %423, %425 : vector<8x264xf32>
    %c0_73 = arith.constant 0 : index
    %c0_74 = arith.constant 0 : index
    %427 = vector.load %arg14[%c0_73, %c0_74] : memref<32x264xf32, #tpu.memory_space<vmem>>, vector<32x264xf32>
    %cst_75 = arith.constant dense<0.000000e+00> : vector<2x264xf32>
    %428 = tpu.matmul %421, %427, %cst_75 {dimension_numbers = #tpu.dot_dimension_numbers<[1], [0], [0], [1], [0, 0, 1, 1], [], []>} : vector<2x32xf32>, vector<32x264xf32>, vector<2x264xf32> -> vector<2x264xf32>
    %c0_76 = arith.constant 0 : index
    %c0_77 = arith.constant 0 : index
    %429 = vector.load %arg15[%c0_76, %c0_77] : memref<1x264xf32, #tpu.memory_space<vmem>>, vector<1x264xf32>
    %430 = vector.broadcast %429 : vector<1x264xf32> to vector<2x264xf32>
    %431 = arith.addf %428, %430 : vector<2x264xf32>
    %432 = vector.extract_strided_slice %431 {offsets = [0, 0], sizes = [1, 264], strides = [1, 1]} : vector<2x264xf32> to vector<1x264xf32>
    %433 = vector.broadcast %432 : vector<1x264xf32> to vector<8x264xf32>
    %434 = arith.mulf %426, %433 : vector<8x264xf32>
    %c0_78 = arith.constant 0 : index
    %c0_79 = arith.constant 0 : index
    %435 = vector.load %arg16[%c0_78, %c0_79] : memref<264x8xf32, #tpu.memory_space<vmem>>, vector<264x8xf32>
    %cst_80 = arith.constant dense<0.000000e+00> : vector<8x8xf32>
    %436 = tpu.matmul %434, %435, %cst_80 {dimension_numbers = #tpu.dot_dimension_numbers<[1], [0], [0], [1], [0, 0, 1, 1], [], []>} : vector<8x264xf32>, vector<264x8xf32>, vector<8x8xf32> -> vector<8x8xf32>
    %437 = vector.extract_strided_slice %431 {offsets = [1, 0], sizes = [1, 264], strides = [1, 1]} : vector<2x264xf32> to vector<1x264xf32>
    %438 = vector.broadcast %437 : vector<1x264xf32> to vector<8x264xf32>
    %439 = arith.mulf %426, %438 : vector<8x264xf32>
    %c0_81 = arith.constant 0 : index
    %c0_82 = arith.constant 0 : index
    %440 = vector.load %arg16[%c0_81, %c0_82] : memref<264x8xf32, #tpu.memory_space<vmem>>, vector<264x8xf32>
    %cst_83 = arith.constant dense<0.000000e+00> : vector<8x8xf32>
    %441 = tpu.matmul %439, %440, %cst_83 {dimension_numbers = #tpu.dot_dimension_numbers<[1], [0], [0], [1], [0, 0, 1, 1], [], []>} : vector<8x264xf32>, vector<264x8xf32>, vector<8x8xf32> -> vector<8x8xf32>
    %442 = tpu.concatenate %436, %441 in 1 : vector<8x8xf32>, vector<8x8xf32> -> vector<8x16xf32>
    %c0_84 = arith.constant 0 : index
    %c0_85 = arith.constant 0 : index
    %443 = vector.load %arg17[%c0_84, %c0_85] : memref<8x16xf32, #tpu.memory_space<vmem>>, vector<8x16xf32>
    tpu.vector_store %arg17[%c0_84, %c0_85], %442 {strides = array<i32>} : memref<8x16xf32, #tpu.memory_space<vmem>>, vector<8x16xf32>,
    return
  }
}

</mosaic_0001>

<bundles_post_ra>
// kernel: biaffine_srl_forward.1
= control target key start
LH: loop header
LB: loop body
LE: loop exit
PB: predicated region body
PF: predicated region fallthrough
CT: control target
= control target key end

     0   :  { %v3901_v0 = vmov 0   ;;  %v3902_v2 = vmov 0.0|0.0   ;;  %vm3903_vm0 = vmmov 0   ;;  %v3904_v13 = vmov 0.0   ;;  %s3907_s30 = smov 64   ;;  %s4779_s0 = inlined_call_operand.vmem [shape: s32[8,1], index: 0, kind: input, shape index: {}]   ;;  %s4780_s1 = inlined_call_operand.vmem [shape: s32[8,1], index: 1, kind: input, shape index: {}]   ;;  %s4781_s3 = inlined_call_operand.vmem [shape: f32[62,32], index: 3, kind: input, shape index: {}]   ;;  %s4782_s4 = inlined_call_operand.vmem [shape: f32[32,128], index: 4, kind: input, shape index: {}]   ;;  %s4783_s5 = inlined_call_operand.vmem [shape: f32[32,128], index: 5, kind: input, shape index: {}]   ;;  %s4784_s6 = inlined_call_operand.vmem [shape: f32[1,128], index: 6, kind: input, shape index: {}]   ;;  %s4785_s7 = inlined_call_operand.vmem [shape: f32[32,128], index: 7, kind: input, shape index: {}]   ;;  %s4786_s8 = inlined_call_operand.vmem [shape: f32[32,128], index: 8, kind: input, shape index: {}]   ;;  %s4787_s9 = inlined_call_operand.vmem [shape: f32[1,128], index: 9, kind: input, shape index: {}]   ;;  %s4788_s2 = inlined_call_operand.vmem [shape: s32[2,1], index: 2, kind: input, shape index: {}]   ;;  %s4789_s10 = inlined_call_operand.vmem [shape: f32[32,64], index: 10, kind: input, shape index: {}]   ;;  %s4790_s12 = inlined_call_operand.vmem [shape: f32[32,264], index: 12, kind: input, shape index: {}]   ;;  %s4791_s11 = inlined_call_operand.vmem [shape: f32[1,64], index: 11, kind: input, shape index: {}]   ;;  %s4792_s14 = inlined_call_operand.vmem [shape: f32[32,264], index: 14, kind: input, shape index: {}]   ;;  %s4793_s16 = inlined_call_operand.vmem [shape: f32[264,8], index: 16, kind: input, shape index: {}]   ;;  %s4794_s15 = inlined_call_operand.vmem [shape: f32[1,264], index: 15, kind: input, shape index: {}]   ;;  %s4795_s13 = inlined_call_operand.vmem [shape: f32[1,264], index: 13, kind: input, shape index: {}]   ;;  %s4796_s17 = inlined_call_operand.vmem [shape: f32[8,16], index: 17, kind: output, shape index: {}]  }
   0x1   :  { %4797 = sst [smem:[#allocation2_spill]] %s4779_s0  ;;  %3772 = vset.pattern.permute.xlu0 %v3901_v0  ;;  %3544 = vmatprep.subr.bf16.mxu0 %v3902_v2  ;;  %v73_v3 = vld [vmem:[%s4781_s3] sm:$0xff]  ;;  %v74_v4 = vld [vmem:[%s4781_s3 + $0x8] sm:$0xff]  ;;  %v75_v5 = vld [vmem:[%s4781_s3 + $0x10] sm:$0xff]  ;;  %vm85_vm1 = vcmask 1045504   ;;  %vm3905_vm2 = vmmov 1   ;;  %v56_v23 = vlaneseq }
   0x2   :  { %4798 = sst [smem:[#allocation3_spill]] %s4780_s1  ;;  %s4799_s26 = sld [smem:[#allocation2_spill]]  ;;  %v76_v6 = vld [vmem:[%s4781_s3 + $0x18] sm:$0xff]  ;;  %3557 = vmatprep.subr.bf16.mxu1 %v3902_v2  ;;  %v3545_v8 = vpack.c.bf16 %v74_v4, %v73_v3  ;;  %v77_v10 = vld [vmem:[%s4781_s3 + $0x20] sm:$0xff]  ;;  %v78_v11 = vld [vmem:[%s4781_s3 + $0x28] sm:$0xff]  ;;  %3295 = vmatprep.mubr.msk.f32.mxu0 %vm3903_vm0, %v3904_v13  ;;  %vm81_vm6 = vcmask 506880  }
   0x3   :  { %s4800_s22 = sld [smem:[#allocation3_spill]]  ;;  %v3548_v9 = vpack.c.bf16 %v76_v6, %v75_v5  ;;  %v3551_v12 = vpack.c.bf16 %v78_v11, %v77_v10  ;;  %v79_v14 = vld [vmem:[%s4781_s3 + $0x30] sm:$0xff]  ;;  %v80_v15 = vld [vmem:[%s4781_s3 + $0x38] sm:$0x3f]  ;;  %3306 = vmatprep.mubr.msk.f32.mxu1 %vm3903_vm0, %v3904_v13  ;;  %v173_v16 = vld [vmem:[%s4782_s4] sm:$0xff]  ;;  %v4056_v24 = vand.u32 127, %v56_v23 }
   0x4   :  { %3546 = vmatpush3.bf16.msra.mxu0 %v3545_v8  ;;  %v174_v17 = vld [vmem:[%s4782_s4 + $0x8] sm:$0xff]  ;;  %v175_v18 = vld [vmem:[%s4782_s4 + $0x10] sm:$0xff]  ;;  %v176_v20 = vld [vmem:[%s4782_s4 + $0x18] sm:$0xff]  ;;  %v3554_v21 = vpack.c.bf16 %v80_v15, %v79_v14  ;;  %vm188_vm7 = vcmask 261120   ;;  %vm1162_vm10 = vcmask 1040384   ;;  %vm1164_vm11 = vcmask 1041408  }
   0x5   :  { %3547 = vmatprep.subr.bf16.mxu0 %v3902_v2  ;;  %v3558_v19 = vpack.c.bf16 %v174_v17, %v173_v16  ;;  %vm3555_vm3 = vmpackc.low %vm85_vm1, %vm3905_vm2  ;;  %v3561_v22 = vpack.c.bf16 %v176_v20, %v175_v18  ;;  %v177_v30 = vld [vmem:[%s4783_s5] sm:$0xff]  ;;  %v178_v31 = vld [vmem:[%s4783_s5 + $0x8] sm:$0xff]  ;;  %v163_v42 = vand.u32 31, %v4056_v24  ;;  %vm172_vm9 = vcmp.lt.s32.totalorder %v4056_v24, 16 }
   0x6   :  { %v4070_v32 = vpack.c.bf16 %v178_v31, %v177_v30  ;;  %v179_v33 = vld [vmem:[%s4783_s5 + $0x10] sm:$0xff]  ;;  %v180_v34 = vld [vmem:[%s4783_s5 + $0x18] sm:$0xff]  ;;  %v3045_v38 = vld [vmem:[%s4784_s6] ss:$0 sm:$0xff]  ;;  %s3906_s6 = smov 32   ;;  %vm1166_vm12 = vcmask 1042432  }
   0x7   :  { %3559 = vmatpush3.bf16.msra.mxu1 %v3558_v19  ;;  %v4080_v35 = vpack.c.bf16 %v180_v34, %v179_v33  ;;  %vm4105_vm8 = vcmp.lt.s32.totalorder %v163_v42, 16  ;;  %vm1168_vm13 = vcmask 1043456   ;;  %vm1170_vm14 = vcmask 1044480  }
   0x8   :  { %v58_v1 = vld [vmem:[%s4799_s26] sm:$0xff]  ;;  %3549 = vmatpush3.bf16.msra.mxu0 %v3548_v9  ;;  %3560 = vmatprep.subr.bf16.mxu1 %v3902_v2  ;;  %vm1173_vm15 = vcmask 1046528   ;;  %vm2259_vm2 = vcmask 64512  }
   0x9   :  { %60 = vperm.xlu0 %3772, %v58_v1   ;;  %v65_v7 = vld [vmem:[%s4800_s22] sm:$0xff]  ;;  %3550 = vmatprep.subr.bf16.mxu0 %v3902_v2 }
   0xb   :  { %3562 = vmatpush3.bf16.msra.mxu1 %v3561_v22 }
   0xc   :  { %3552 = vmatpush3.bf16.msra.mxu0 %v3551_v12  ;;  %3563 = vmatprep.subr.bf16.mxu1 %v3902_v2 }
   0xd   :  { %67 = vperm.xlu0 %3772, %v65_v7   ;;  %3553 = vmatprep.subr.bf16.mxu0 %v3902_v2 }
  0x10   :  { %3556 = vmatpush3.bf16.msk.msra.mxu0 %vm3555_vm3, %v3554_v21 }
  0x11   :  { %3569 = vmatprep.subr.bf16.mxu0 %v3902_v2 }
  0x88   :  { %v61_v25 = vpop.permute.xlu0 %60 }
  0x89   :  { %vm62_vm4 = vcmp.eq.s32.totalorder %v4056_v24, %v61_v25 }
  0x8a   :  { %v3041_v27 = vsel %vm62_vm4, 1.0, %v3904_v13 }
  0x8c   :  { %v68_v26 = vpop.permute.xlu0 %67 }
  0x8d   :  { %vm69_vm5 = vcmp.eq.s32.totalorder %v4056_v24, %v68_v26 }
  0x8e   :  { %v3042_v28 = vsel %vm69_vm5, 1.0, %v3904_v13 }
  0x8f   :  { %v72_v29 = vadd.f32 %v3042_v28, %v3041_v27 }
  0x91   :  { %3296 = vmatmul.mubr.msk.f32.vlgmr.msra.gmra.mrb[0].mxu0 %vm81_vm6, %v72_v29 }
  0x92   :  { %3328 = vmatprep.mubr.msk.f32.mxu0 %vm3903_vm0, %v3904_v13  ;;  %3571 = vmatpush3.bf16.msra.mxu0 %v4070_v32 }
  0x93   :  { %3572 = vmatprep.subr.bf16.mxu0 %v3902_v2 }
  0x96   :  { %3574 = vmatpush3.bf16.msra.mxu0 %v4080_v35 }
  0x97   :  { %3581 = vmatprep.subr.bf16.mxu0 %v3902_v2 }
 0x164   :  { %v155_v36 = vpop.f32.mrb[0].mxu0 }
 0x165   :  { %v3297_v37 = vpop.f32.mrb[1].mxu0  ;;  %3307 = vmatmul.mubr.msk.f32.vlgmr.msra.gmra.mrb[0].mxu1 %vm188_vm7, %v155_v36 }
 0x166   :  { %3565 = vmatpush3.bf16.msra.mxu1 %v4070_v32  ;;  %3317 = vmatprep.mubr.msk.f32.mxu1 %vm3903_vm0, %v3904_v13 }
 0x167   :  { %3566 = vmatprep.subr.bf16.mxu1 %v3902_v2 }
 0x16a   :  { %3568 = vmatpush3.bf16.msra.mxu1 %v4080_v35 }
 0x16b   :  { %3575 = vmatprep.subr.bf16.mxu1 %v3902_v2 }
 0x16d   :  { %3318 = vmatmul.mubr.f32.vlgmr.msra.gmra.mrb[2].mxu1 %v3904_v13 }
 0x16e   :  { %3577 = vmatpush3.bf16.msra.mxu1 %v4070_v32  ;;  %3339 = vmatprep.mubr.msk.f32.mxu1 %vm3903_vm0, %v3904_v13 }
 0x16f   :  { %3578 = vmatprep.subr.bf16.mxu1 %v3902_v2 }
 0x172   :  { %3580 = vmatpush3.bf16.msra.mxu1 %v4080_v35 }
 0x173   :  { %3587 = vmatprep.subr.bf16.mxu1 %v3902_v2 }
 0x238   :  { %v258_v39 = vpop.f32.mrb[0].mxu1 }
 0x239   :  { %v4101_v40 = vadd.f32 %v3045_v38, %v258_v39  ;;  %v3308_v41 = vpop.f32.mrb[1].mxu1 }
 0x23b   :  { %v263_v43 = vrot.slane %v4101_v40, 7  ;;  %v364_v63 = vrot.slane %v4101_v40, 5  ;;  %v473_v25 = vrot.slane %v4101_v40, 3 }
 0x23d   :  { %v4112_v45 = vsel %vm4105_vm8, %v4101_v40, %v263_v43  ;;  %v4133_v4 = vsel %vm4105_vm8, %v4101_v40, %v364_v63  ;;  %v4154_v29 = vsel %vm4105_vm8, %v4101_v40, %v473_v25 }
 0x240   :  { %v335_v46 = vpop.f32.mrb[2].mxu1 }
 0x241   :  { %v339_v47 = vadd.f32 %v335_v46, %v4112_v45  ;;  %v3319_v48 = vpop.f32.mrb[3].mxu1 }
 0x243   :  { %3773 = vtanh.f32 %v339_v47  ;;  %v3047_v50 = vmul.f32 -1.442695, %v339_v47 }
 0x245   :  { %3775 = vpow2.f32 %v3047_v50 }
 0x24d   :  { %v3774_v49 = vpop.eup %3773 }
 0x24e   :  { %349 = vrot.lane.b32.xlu1 %v3774_v49, %s3906_s6 }
 0x24f   :  { %v3776_v51 = vpop.eup %3775 }
 0x250   :  { %v343_v52 = vadd.f32 1.0, %v3776_v51 }
 0x252   :  { %3777 = vrcp.f32 %v343_v52  ;;  %v583_v52 = vrot.slane %v4101_v40, 1 }
 0x25c   :  { %v3778_v53 = vpop.eup %3777 }
 0x25d   :  { %v347_v56 = vmul.f32 0.0, %v3778_v53 }
 0x2c0   :  { %v350_v54 = vpop.permute.xlu1 %349 }
 0x2c1   :  { %v352_v55 = vmul.f32 %v3778_v53, %v350_v54 }
 0x2c3   :  { %354 = vrot.lane.b32.xlu1 %v352_v55, %s3906_s6 }
 0x335   :  { %v355_v57 = vpop.permute.xlu1 %354 }
 0x336   :  { %v357_v58 = vadd.f32 %v355_v57, %v347_v56  ;;  %v4175_v56 = vsel %vm4105_vm8, %v4101_v40, %v583_v52 }
 0x338   :  { %3779 = vtanh.f32 %v357_v58  ;;  %v454_v14 = vrot.slane %v357_v58, 7 }
 0x342   :  { %v3780_v59 = vpop.eup %3779 }
 0x343   :  { %360 = vrot.lane.b32.xlu0 %v3780_v59, %s3906_s6 }
 0x3b5   :  { %v361_v60 = vpop.permute.xlu0 %360 }
 0x3b6   :  { %v363_v61 = vmul.f32 %v3778_v53, %v361_v60 }
 0x3b8   :  { %368 = vrot.lane.b32.xlu1 %v363_v61, %s3907_s30 }
 0x42a   :  { %v4119_v62 = vpop.permute.xlu1 %368 }
 0x42b   :  { %3329 = vmatmul.mubr.msk.f32.vlgmr.msra.gmra.mrb[2].mxu0 %vm188_vm7, %v4119_v62 }
 0x42c   :  { %3583 = vmatpush3.bf16.msra.mxu0 %v4070_v32  ;;  %3350 = vmatprep.mubr.msk.f32.mxu0 %vm3903_vm0, %v3904_v13 }
 0x42d   :  { %3584 = vmatprep.subr.bf16.mxu0 %v3902_v2 }
 0x430   :  { %3586 = vmatpush3.bf16.msra.mxu0 %v4080_v35 }
 0x431   :  { %3593 = vmatprep.subr.bf16.mxu0 %v3902_v2 }
 0x4fe   :  { %v438_v0 = vpop.f32.mrb[2].mxu0 }
 0x4ff   :  { %v443_v1 = vrot.slane %v438_v0, 7  ;;  %v3330_v3 = vpop.f32.mrb[3].mxu0 }
 0x501   :  { %v445_v5 = vadd.f32 %v443_v1, %v4133_v4 }
 0x503   :  { %3781 = vtanh.f32 %v445_v5  ;;  %v3049_v7 = vmul.f32 -1.442695, %v445_v5 }
 0x505   :  { %3783 = vpow2.f32 %v3049_v7 }
 0x50d   :  { %v3782_v6 = vpop.eup %3781 }
 0x50e   :  { %458 = vrot.lane.b32.xlu0 %v3782_v6, %s3906_s6 }
 0x50f   :  { %v3784_v8 = vpop.eup %3783 }
 0x510   :  { %v449_v9 = vadd.f32 1.0, %v3784_v8 }
 0x512   :  { %3785 = vrcp.f32 %v449_v9 }
 0x51c   :  { %v3786_v10 = vpop.eup %3785 }
 0x51d   :  { %v456_v15 = vmul.f32 %v3786_v10, %v454_v14 }
 0x580   :  { %v459_v11 = vpop.permute.xlu0 %458 }
 0x581   :  { %v461_v12 = vmul.f32 %v3786_v10, %v459_v11 }
 0x583   :  { %463 = vrot.lane.b32.xlu1 %v461_v12, %s3906_s6 }
 0x5f5   :  { %v464_v16 = vpop.permute.xlu1 %463 }
 0x5f6   :  { %v466_v17 = vadd.f32 %v464_v16, %v456_v15 }
 0x5f8   :  { %3787 = vtanh.f32 %v466_v17  ;;  %v564_v41 = vrot.slane %v466_v17, 7 }
 0x602   :  { %v3788_v18 = vpop.eup %3787 }
 0x603   :  { %469 = vrot.lane.b32.xlu0 %v3788_v18, %s3906_s6 }
 0x675   :  { %v470_v19 = vpop.permute.xlu0 %469 }
 0x676   :  { %v472_v20 = vmul.f32 %v3786_v10, %v470_v19 }
 0x678   :  { %v477_v21 = vrot.slane %v472_v20, 1 }
 0x67a   :  { %478 = vrot.lane.b32.xlu1 %v477_v21, %s3907_s30 }
 0x6ec   :  { %v4140_v22 = vpop.permute.xlu1 %478 }
 0x6ed   :  { %3340 = vmatmul.mubr.msk.f32.vlgmr.msra.gmra.mrb[4].mxu1 %vm188_vm7, %v4140_v22 }
 0x6ee   :  { %3589 = vmatpush3.bf16.msra.mxu1 %v4070_v32  ;;  %3361 = vmatprep.mubr.msk.f32.mxu1 %vm3903_vm0, %v3904_v13 }
 0x6ef   :  { %3590 = vmatprep.subr.bf16.mxu1 %v3902_v2 }
 0x6f2   :  { %3592 = vmatpush3.bf16.msra.mxu1 %v4080_v35 }
 0x6f3   :  { %3599 = vmatprep.subr.bf16.mxu1 %v3902_v2 }
 0x7c0   :  { %v548_v26 = vpop.f32.mrb[4].mxu1 }
 0x7c1   :  { %v553_v27 = vrot.slane %v548_v26, 6  ;;  %v3341_v28 = vpop.f32.mrb[5].mxu1 }
 0x7c3   :  { %v555_v30 = vadd.f32 %v553_v27, %v4154_v29 }
 0x7c5   :  { %3789 = vtanh.f32 %v555_v30  ;;  %v3051_v33 = vmul.f32 -1.442695, %v555_v30 }
 0x7c7   :  { %3791 = vpow2.f32 %v3051_v33 }
 0x7cf   :  { %v3790_v31 = vpop.eup %3789 }
 0x7d0   :  { %568 = vrot.lane.b32.xlu0 %v3790_v31, %s3906_s6 }
 0x7d1   :  { %v3792_v34 = vpop.eup %3791 }
 0x7d2   :  { %v559_v36 = vadd.f32 1.0, %v3792_v34 }
 0x7d4   :  { %3793 = vrcp.f32 %v559_v36 }
 0x7de   :  { %v3794_v37 = vpop.eup %3793 }
 0x7df   :  { %v566_v42 = vmul.f32 %v3794_v37, %v564_v41 }
 0x842   :  { %v569_v38 = vpop.permute.xlu0 %568 }
 0x843   :  { %v571_v39 = vmul.f32 %v3794_v37, %v569_v38 }
 0x845   :  { %573 = vrot.lane.b32.xlu1 %v571_v39, %s3906_s6 }
 0x8b7   :  { %v574_v43 = vpop.permute.xlu1 %573 }
 0x8b8   :  { %v576_v46 = vadd.f32 %v574_v43, %v566_v42 }
 0x8ba   :  { %3795 = vtanh.f32 %v576_v46  ;;  %v674_v3 = vrot.slane %v576_v46, 7 }
 0x8c4   :  { %v3796_v47 = vpop.eup %3795 }
 0x8c5   :  { %579 = vrot.lane.b32.xlu0 %v3796_v47, %s3906_s6 }
 0x937   :  { %v580_v48 = vpop.permute.xlu0 %579 }
 0x938   :  { %v582_v49 = vmul.f32 %v3794_v37, %v580_v48 }
 0x93a   :  { %v587_v50 = vrot.slane %v582_v49, 2 }
 0x93c   :  { %588 = vrot.lane.b32.xlu1 %v587_v50, %s3907_s30 }
 0x9ae   :  { %v4161_v51 = vpop.permute.xlu1 %588 }
 0x9af   :  { %3351 = vmatmul.mubr.msk.f32.vlgmr.msra.gmra.mrb[4].mxu0 %vm188_vm7, %v4161_v51 }
 0x9b0   :  { %3595 = vmatpush3.bf16.msra.mxu0 %v4070_v32  ;;  %3372 = vmatprep.mubr.msk.f32.mxu0 %vm3903_vm0, %v3904_v13 }
 0x9b1   :  { %3596 = vmatprep.subr.bf16.mxu0 %v3902_v2 }
 0x9b4   :  { %3598 = vmatpush3.bf16.msra.mxu0 %v4080_v35 }
 0x9b5   :  { %3605 = vmatprep.subr.bf16.mxu0 %v3902_v2 }
 0xa82   :  { %v658_v53 = vpop.f32.mrb[4].mxu0 }
 0xa83   :  { %v663_v54 = vrot.slane %v658_v53, 5  ;;  %v3352_v55 = vpop.f32.mrb[5].mxu0 }
 0xa85   :  { %v665_v57 = vadd.f32 %v663_v54, %v4175_v56 }
 0xa87   :  { %3797 = vtanh.f32 %v665_v57  ;;  %v3053_v59 = vmul.f32 -1.442695, %v665_v57 }
 0xa89   :  { %3799 = vpow2.f32 %v3053_v59 }
 0xa91   :  { %v3798_v58 = vpop.eup %3797 }
 0xa92   :  { %678 = vrot.lane.b32.xlu0 %v3798_v58, %s3906_s6 }
 0xa93   :  { %v3800_v60 = vpop.eup %3799 }
 0xa94   :  { %v669_v61 = vadd.f32 1.0, %v3800_v60 }
 0xa96   :  { %3801 = vrcp.f32 %v669_v61 }
 0xaa0   :  { %v3802_v63 = vpop.eup %3801 }
 0xaa1   :  { %v676_v5 = vmul.f32 %v3802_v63, %v674_v3 }
 0xb04   :  { %v679_v0 = vpop.permute.xlu0 %678 }
 0xb05   :  { %v681_v1 = vmul.f32 %v3802_v63, %v679_v0 }
 0xb07   :  { %683 = vrot.lane.b32.xlu1 %v681_v1, %s3906_s6 }
 0xb79   :  { %v684_v40 = vpop.permute.xlu1 %683 }
 0xb7a   :  { %v686_v6 = vadd.f32 %v684_v40, %v676_v5 }
 0xb7c   :  { %3803 = vtanh.f32 %v686_v6  ;;  %v781_v27 = vrot.slane %v686_v6, 7 }
 0xb86   :  { %v3804_v7 = vpop.eup %3803 }
 0xb87   :  { %689 = vrot.lane.b32.xlu0 %v3804_v7, %s3906_s6 }
 0xbf9   :  { %v690_v8 = vpop.permute.xlu0 %689 }
 0xbfa   :  { %v692_v9 = vmul.f32 %v3802_v63, %v690_v8 }
 0xbfc   :  { %v694_v10 = vrot.slane %v692_v9, 3 }
 0xbfe   :  { %695 = vrot.lane.b32.xlu1 %v694_v10, %s3907_s30 }
 0xc70   :  { %v4182_v11 = vpop.permute.xlu1 %695 }
 0xc71   :  { %3362 = vmatmul.mubr.msk.f32.vlgmr.msra.gmra.mrb[6].mxu1 %vm188_vm7, %v4182_v11 }
 0xc72   :  { %3601 = vmatpush3.bf16.msra.mxu1 %v4070_v32  ;;  %3383 = vmatprep.mubr.msk.f32.mxu1 %vm3903_vm0, %v3904_v13 }
 0xc73   :  { %3602 = vmatprep.subr.bf16.mxu1 %v3902_v2 }
 0xc76   :  { %3604 = vmatpush3.bf16.msra.mxu1 %v4080_v35 }
 0xc77   :  { %3611 = vmatprep.subr.bf16.mxu1 %v3902_v2 }
 0xd44   :  { %v765_v12 = vpop.f32.mrb[6].mxu1 }
 0xd45   :  { %v770_v14 = vrot.slane %v765_v12, 4  ;;  %v3363_v15 = vpop.f32.mrb[7].mxu1 }
 0xd47   :  { %v772_v16 = vadd.f32 %v770_v14, %v4112_v45 }
 0xd49   :  { %3805 = vtanh.f32 %v772_v16  ;;  %v3055_v18 = vmul.f32 -1.442695, %v772_v16 }
 0xd4b   :  { %3807 = vpow2.f32 %v3055_v18 }
 0xd53   :  { %v3806_v17 = vpop.eup %3805 }
 0xd54   :  { %785 = vrot.lane.b32.xlu0 %v3806_v17, %s3906_s6 }
 0xd55   :  { %v3808_v19 = vpop.eup %3807 }
 0xd56   :  { %v776_v20 = vadd.f32 1.0, %v3808_v19 }
 0xd58   :  { %3809 = vrcp.f32 %v776_v20 }
 0xd62   :  { %v3810_v21 = vpop.eup %3809 }
 0xd63   :  { %v783_v28 = vmul.f32 %v3810_v21, %v781_v27 }
 0xdc6   :  { %v786_v25 = vpop.permute.xlu0 %785 }
 0xdc7   :  { %v788_v26 = vmul.f32 %v3810_v21, %v786_v25 }
 0xdc9   :  { %790 = vrot.lane.b32.xlu1 %v788_v26, %s3906_s6 }
 0xe3b   :  { %v791_v30 = vpop.permute.xlu1 %790 }
 0xe3c   :  { %v793_v31 = vadd.f32 %v791_v30, %v783_v28 }
 0xe3e   :  { %3811 = vtanh.f32 %v793_v31 }
 0xe48   :  { %v3812_v45 = vpop.eup %3811 }
 0xe49   :  { %796 = vrot.lane.b32.xlu0 %v3812_v45, %s3906_s6 }
 0xebb   :  { %v797_v33 = vpop.permute.xlu0 %796 }
 0xebc   :  { %v799_v34 = vmul.f32 %v3810_v21, %v797_v33 }
 0xebe   :  { %v801_v36 = vrot.slane %v799_v34, 4 }
 0xec0   :  { %802 = vrot.lane.b32.xlu1 %v801_v36, %s3907_s30 }
 0xf32   :  { %v4197_v37 = vpop.permute.xlu1 %802 }
 0xf33   :  { %3373 = vmatmul.mubr.msk.f32.vlgmr.msra.gmra.mrb[6].mxu0 %vm188_vm7, %v4197_v37 }
 0xf34   :  { %3607 = vmatpush3.bf16.msra.mxu0 %v4070_v32  ;;  %3394 = vmatprep.mubr.msk.f32.mxu0 %vm3903_vm0, %v3904_v13 }
 0xf35   :  { %3608 = vmatprep.subr.bf16.mxu0 %v3902_v2 }
 0xf38   :  { %3610 = vmatpush3.bf16.msra.mxu0 %v4080_v35  ;;  %v888_v35 = vrot.slane %v793_v31, 7 }
 0xf39   :  { %3617 = vmatprep.subr.bf16.mxu0 %v3902_v2 }
0x1006   :  { %v872_v38 = vpop.f32.mrb[6].mxu0 }
0x1007   :  { %v877_v39 = vrot.slane %v872_v38, 3  ;;  %v3374_v41 = vpop.f32.mrb[7].mxu0 }
0x1008   :  { %v1175_v41 = vld [vmem:[%s4785_s7] sm:$0xff] }
0x1009   :  { %v879_v42 = vadd.f32 %v877_v39, %v4133_v4 }
0x100b   :  { %3813 = vtanh.f32 %v879_v42  ;;  %v3057_v46 = vmul.f32 -1.442695, %v879_v42  ;;  %v1176_v42 = vld [vmem:[%s4785_s7 + $0x8] sm:$0xff] }
0x100d   :  { %3815 = vpow2.f32 %v3057_v46  ;;  %v1177_v46 = vld [vmem:[%s4785_s7 + $0x10] sm:$0xff] }
0x1015   :  { %v3814_v43 = vpop.eup %3813 }
0x1016   :  { %892 = vrot.lane.b32.xlu0 %v3814_v43, %s3906_s6  ;;  %v3612_v43 = vpack.c.bf16 %v1176_v42, %v1175_v41 }
0x1017   :  { %v3816_v32 = vpop.eup %3815 }
0x1018   :  { %v883_v47 = vadd.f32 1.0, %v3816_v32  ;;  %v1178_v32 = vld [vmem:[%s4785_s7 + $0x18] sm:$0xff] }
0x101a   :  { %3817 = vrcp.f32 %v883_v47  ;;  %v1179_v47 = vld [vmem:[%s4786_s8] sm:$0xff] }
0x1024   :  { %v3818_v48 = vpop.eup %3817 }
0x1025   :  { %v890_v52 = vmul.f32 %v3818_v48, %v888_v35  ;;  %v1181_v35 = vld [vmem:[%s4786_s8 + $0x10] sm:$0xff] }
0x1088   :  { %v893_v49 = vpop.permute.xlu0 %892 }
0x1089   :  { %v895_v50 = vmul.f32 %v3818_v48, %v893_v49  ;;  %v1180_v49 = vld [vmem:[%s4786_s8 + $0x8] sm:$0xff] }
0x108b   :  { %897 = vrot.lane.b32.xlu1 %v895_v50, %s3906_s6  ;;  %v4252_v50 = vpack.c.bf16 %v1180_v49, %v1179_v47 }
0x10fd   :  { %v898_v53 = vpop.permute.xlu1 %897 }
0x10fe   :  { %v900_v54 = vadd.f32 %v898_v53, %v890_v52  ;;  %v1182_v52 = vld [vmem:[%s4786_s8 + $0x18] sm:$0xff] }
0x10ff   :  { %v4263_v53 = vpack.c.bf16 %v1182_v52, %v1181_v35 }
0x1100   :  { %3819 = vtanh.f32 %v900_v54  ;;  %v995_v9 = vrot.slane %v900_v54, 7 }
0x110a   :  { %v3820_v4 = vpop.eup %3819 }
0x110b   :  { %903 = vrot.lane.b32.xlu0 %v3820_v4, %s3906_s6 }
0x117d   :  { %v904_v55 = vpop.permute.xlu0 %903 }
0x117e   :  { %v906_v57 = vmul.f32 %v3818_v48, %v904_v55  ;;  %v3615_v48 = vpack.c.bf16 %v1178_v32, %v1177_v46 }
0x1180   :  { %v908_v58 = vrot.slane %v906_v57, 5 }
0x1182   :  { %909 = vrot.lane.b32.xlu1 %v908_v58, %s3907_s30 }
0x11f4   :  { %v4212_v59 = vpop.permute.xlu1 %909 }
0x11f5   :  { %3384 = vmatmul.mubr.msk.f32.vlgmr.msra.gmra.mrb[8].mxu1 %vm188_vm7, %v4212_v59  ;;  %v1133_v58 = vsel %vm172_vm9, %v4161_v51, %v4212_v59 }
0x11f6   :  { %3405 = vmatprep.mubr.msk.f32.mxu1 %vm3903_vm0, %v3904_v13  ;;  %3613 = vmatpush3.bf16.msra.mxu1 %v3612_v43 }
0x11f7   :  { %3614 = vmatprep.subr.bf16.mxu1 %v3902_v2 }
0x11fa   :  { %3616 = vmatpush3.bf16.msra.mxu1 %v3615_v48 }
0x11fb   :  { %3623 = vmatprep.subr.bf16.mxu1 %v3902_v2 }
0x12c8   :  { %v979_v60 = vpop.f32.mrb[8].mxu1 }
0x12c9   :  { %v984_v61 = vrot.slane %v979_v60, 2  ;;  %v3385_v63 = vpop.f32.mrb[9].mxu1  ;;  %v1136_v60 = vsel %vm172_vm9, %v4182_v11, %v4197_v37 }
0x12cb   :  { %v986_v0 = vadd.f32 %v984_v61, %v4154_v29  ;;  %v1137_v61 = vsel %vm172_vm9, %v4197_v37, %v4182_v11 }
0x12cd   :  { %3821 = vtanh.f32 %v986_v0  ;;  %v3059_v3 = vmul.f32 -1.442695, %v986_v0 }
0x12cf   :  { %3823 = vpow2.f32 %v3059_v3  ;;  %v1145_v3 = vrot.slane %v1133_v58, 6 }
0x12d7   :  { %v3822_v1 = vpop.eup %3821 }
0x12d8   :  { %999 = vrot.lane.b32.xlu0 %v3822_v1, %s3906_s6  ;;  %v1138_v1 = vsel %vm172_vm9, %v4212_v59, %v4161_v51 }
0x12d9   :  { %v3824_v5 = vpop.eup %3823 }
0x12da   :  { %v990_v40 = vadd.f32 1.0, %v3824_v5 }
0x12dc   :  { %3825 = vrcp.f32 %v990_v40  ;;  %v1148_v40 = vrot.slane %v1136_v60, 5 }
0x12e6   :  { %v3826_v6 = vpop.eup %3825 }
0x12e7   :  { %v997_v10 = vmul.f32 %v3826_v6, %v995_v9 }
0x134a   :  { %v1000_v7 = vpop.permute.xlu0 %999 }
0x134b   :  { %v1002_v8 = vmul.f32 %v3826_v6, %v1000_v7  ;;  %v1154_v7 = vrot.slane %v1138_v1, 3 }
0x134d   :  { %1004 = vrot.lane.b32.xlu1 %v1002_v8, %s3906_s6 }
0x13bf   :  { %v1005_v12 = vpop.permute.xlu1 %1004 }
0x13c0   :  { %v1007_v14 = vadd.f32 %v1005_v12, %v997_v10 }
0x13c2   :  { %3827 = vtanh.f32 %v1007_v14  ;;  %v1102_v34 = vrot.slane %v1007_v14, 7 }
0x13cc   :  { %v3828_v29 = vpop.eup %3827 }
0x13cd   :  { %1010 = vrot.lane.b32.xlu0 %v3828_v29, %s3906_s6 }
0x143f   :  { %v1011_v15 = vpop.permute.xlu0 %1010 }
0x1440   :  { %v1013_v16 = vmul.f32 %v3826_v6, %v1011_v15  ;;  %v1151_v6 = vrot.slane %v1137_v61, 4 }
0x1442   :  { %v1015_v17 = vrot.slane %v1013_v16, 6  ;;  %v3062_v16 = vld [vmem:[%s4787_s9] ss:$0 sm:$0xff] }
0x1444   :  { %1016 = vrot.lane.b32.xlu1 %v1015_v17, %s3907_s30 }
0x14b6   :  { %v4223_v18 = vpop.permute.xlu1 %1016 }
0x14b7   :  { %3395 = vmatmul.mubr.msk.f32.vlgmr.msra.gmra.mrb[8].mxu0 %vm188_vm7, %v4223_v18  ;;  %v1130_v57 = vsel %vm172_vm9, %v4140_v22, %v4223_v18  ;;  %v1139_v11 = vsel %vm172_vm9, %v4223_v18, %v4140_v22 }
0x14b8   :  { %3416 = vmatprep.mubr.msk.f32.mxu0 %vm3903_vm0, %v3904_v13  ;;  %3619 = vmatpush3.bf16.msra.mxu0 %v4252_v50  ;;  %v1142_v63 = vrot.slane %v1130_v57, 7  ;;  %v1157_v9 = vrot.slane %v1139_v11, 2 }
0x14b9   :  { %3620 = vmatprep.subr.bf16.mxu0 %v3902_v2 }
0x14bc   :  { %3622 = vmatpush3.bf16.msra.mxu0 %v4263_v53 }
0x14bd   :  { %3629 = vmatprep.subr.bf16.mxu0 %v3902_v2 }
0x14bf   :  { %3417 = vmatmul.mubr.f32.vlgmr.msra.gmra.mrb[10].mxu0 %v3904_v13 }
0x14c0   :  { %3631 = vmatpush3.bf16.msra.mxu0 %v4252_v50  ;;  %3438 = vmatprep.mubr.msk.f32.mxu0 %vm3903_vm0, %v3904_v13 }
0x14c1   :  { %3632 = vmatprep.subr.bf16.mxu0 %v3902_v2 }
0x14c4   :  { %3634 = vmatpush3.bf16.msra.mxu0 %v4263_v53 }
0x14c5   :  { %3641 = vmatprep.subr.bf16.mxu0 %v3902_v2 }
0x158a   :  { %v1086_v19 = vpop.f32.mrb[8].mxu0 }
0x158b   :  { %v1091_v20 = vrot.slane %v1086_v19, 1  ;;  %v3396_v21 = vpop.f32.mrb[9].mxu0 }
0x158d   :  { %v1093_v25 = vadd.f32 %v1091_v20, %v4175_v56 }
0x158f   :  { %3829 = vtanh.f32 %v1093_v25  ;;  %v3061_v27 = vmul.f32 -1.442695, %v1093_v25 }
0x1591   :  { %3831 = vpow2.f32 %v3061_v27 }
0x1599   :  { %v3830_v26 = vpop.eup %3829 }
0x159a   :  { %1106 = vrot.lane.b32.xlu0 %v3830_v26, %s3906_s6 }
0x159b   :  { %v3832_v28 = vpop.eup %3831 }
0x159c   :  { %v1097_v30 = vadd.f32 1.0, %v3832_v28 }
0x159e   :  { %3833 = vrcp.f32 %v1097_v30 }
0x15a8   :  { %v3834_v31 = vpop.eup %3833 }
0x15a9   :  { %v1104_v36 = vmul.f32 %v3834_v31, %v1102_v34 }
0x160c   :  { %v1107_v45 = vpop.permute.xlu0 %1106 }
0x160d   :  { %v1109_v33 = vmul.f32 %v3834_v31, %v1107_v45 }
0x160f   :  { %1111 = vrot.lane.b32.xlu1 %v1109_v33, %s3906_s6 }
0x1681   :  { %v1112_v38 = vpop.permute.xlu1 %1111 }
0x1682   :  { %v1114_v39 = vadd.f32 %v1112_v38, %v1104_v36 }
0x1684   :  { %3835 = vtanh.f32 %v1114_v39 }
0x168e   :  { %v3836_v56 = vpop.eup %3835 }
0x168f   :  { %1117 = vrot.lane.b32.xlu0 %v3836_v56, %s3906_s6 }
0x1701   :  { %v1118_v54 = vpop.permute.xlu0 %1117 }
0x1702   :  { %v1120_v4 = vmul.f32 %v3834_v31, %v1118_v54 }
0x1704   :  { %v1123_v55 = vrot.slane %v1120_v4, 7 }
0x1706   :  { %1124 = vrot.lane.b32.xlu1 %v1123_v55, %s3907_s30 }
0x1778   :  { %v1125_v0 = vpop.permute.xlu1 %1124 }
0x1779   :  { %v1127_v5 = vsel %vm172_vm9, %v4119_v62, %v1125_v0  ;;  %v1140_v51 = vsel %vm172_vm9, %v1125_v0, %v4119_v62  ;;  %v1333_v62 = vpop.f32.mrb[10].mxu0 }
0x177a   :  { %v1163_v37 = vsel %vm1162_vm10, %v1127_v5, %v1142_v63  ;;  %v1160_v12 = vrot.slane %v1140_v51, 1  ;;  %v3418_v15 = vpop.f32.mrb[11].mxu0 }
0x177b   :  { %v1165_v59 = vsel %vm1164_vm11, %v1163_v37, %v1145_v3 }
0x177c   :  { %v1167_v8 = vsel %vm1166_vm12, %v1165_v59, %v1148_v40 }
0x177d   :  { %v1169_v10 = vsel %vm1168_vm13, %v1167_v8, %v1151_v6 }
0x177e   :  { %v1171_v22 = vsel %vm1170_vm14, %v1169_v10, %v1154_v7 }
0x177f   :  { %v1172_v14 = vsel %vm85_vm1, %v1171_v22, %v1157_v9 }
0x1780   :  { %v1174_v29 = vsel %vm1173_vm15, %v1172_v14, %v1160_v12 }
0x1781   :  { %3406 = vmatmul.mubr.msk.f32.vlgmr.msra.gmra.mrb[10].mxu1 %vm188_vm7, %v1174_v29 }
0x1782   :  { %3625 = vmatpush3.bf16.msra.mxu1 %v4252_v50  ;;  %3427 = vmatprep.mubr.msk.f32.mxu1 %vm3903_vm0, %v3904_v13 }
0x1783   :  { %3626 = vmatprep.subr.bf16.mxu1 %v3902_v2 }
0x1786   :  { %3628 = vmatpush3.bf16.msra.mxu1 %v4263_v53 }
0x1787   :  { %3635 = vmatprep.subr.bf16.mxu1 %v3902_v2 }
0x1854   :  { %v1259_v17 = vpop.f32.mrb[10].mxu1 }
0x1855   :  { %v4323_v18 = vadd.f32 %v3062_v16, %v1259_v17  ;;  %v3407_v19 = vpop.f32.mrb[11].mxu1 }
0x1857   :  { %v1264_v20 = vrot.slane %v4323_v18, 7  ;;  %v1362_v43 = vrot.slane %v4323_v18, 5  ;;  %v1471_v37 = vrot.slane %v4323_v18, 3 }
0x1859   :  { %v4329_v21 = vsel %vm4105_vm8, %v4323_v18, %v1264_v20  ;;  %v4350_v48 = vsel %vm4105_vm8, %v4323_v18, %v1362_v43  ;;  %v4371_v7 = vsel %vm4105_vm8, %v4323_v18, %v1471_v37 }
0x185a   :  { %v1337_v25 = vadd.f32 %v1333_v62, %v4329_v21 }
0x185c   :  { %3837 = vtanh.f32 %v1337_v25  ;;  %v3064_v27 = vmul.f32 -1.442695, %v1337_v25 }
0x185e   :  { %3839 = vpow2.f32 %v3064_v27 }
0x1866   :  { %v3838_v26 = vpop.eup %3837 }
0x1867   :  { %1347 = vrot.lane.b32.xlu0 %v3838_v26, %s3906_s6 }
0x1868   :  { %v3840_v28 = vpop.eup %3839 }
0x1869   :  { %v1341_v30 = vadd.f32 1.0, %v3840_v28 }
0x186b   :  { %3841 = vrcp.f32 %v1341_v30  ;;  %v1581_v30 = vrot.slane %v4323_v18, 1 }
0x1875   :  { %v3842_v31 = vpop.eup %3841 }
0x1876   :  { %v1345_v34 = vmul.f32 0.0, %v3842_v31 }
0x18d9   :  { %v1348_v45 = vpop.permute.xlu0 %1347 }
0x18da   :  { %v1350_v33 = vmul.f32 %v3842_v31, %v1348_v45 }
0x18dc   :  { %1352 = vrot.lane.b32.xlu1 %v1350_v33, %s3906_s6 }
0x194e   :  { %v1353_v36 = vpop.permute.xlu1 %1352 }
0x194f   :  { %v1355_v38 = vadd.f32 %v1353_v36, %v1345_v34  ;;  %v4392_v34 = vsel %vm4105_vm8, %v4323_v18, %v1581_v30 }
0x1951   :  { %3843 = vtanh.f32 %v1355_v38  ;;  %v1452_v60 = vrot.slane %v1355_v38, 7 }
0x195b   :  { %v3844_v39 = vpop.eup %3843 }
0x195c   :  { %1358 = vrot.lane.b32.xlu0 %v3844_v39, %s3906_s6 }
0x19ce   :  { %v1359_v56 = vpop.permute.xlu0 %1358 }
0x19cf   :  { %v1361_v41 = vmul.f32 %v3842_v31, %v1359_v56 }
0x19d1   :  { %1366 = vrot.lane.b32.xlu1 %v1361_v41, %s3907_s30 }
0x1a43   :  { %v4336_v42 = vpop.permute.xlu1 %1366 }
0x1a44   :  { %3428 = vmatmul.mubr.msk.f32.vlgmr.msra.gmra.mrb[12].mxu1 %vm188_vm7, %v4336_v42 }
0x1a45   :  { %3637 = vmatpush3.bf16.msra.mxu1 %v4252_v50  ;;  %3449 = vmatprep.mubr.msk.f32.mxu1 %vm3903_vm0, %v3904_v13 }
0x1a46   :  { %3638 = vmatprep.subr.bf16.mxu1 %v3902_v2 }
0x1a49   :  { %3640 = vmatpush3.bf16.msra.mxu1 %v4263_v53 }
0x1a4a   :  { %3647 = vmatprep.subr.bf16.mxu1 %v3902_v2 }
0x1b17   :  { %v1436_v46 = vpop.f32.mrb[12].mxu1 }
0x1b18   :  { %v1441_v32 = vrot.slane %v1436_v46, 7  ;;  %v3429_v47 = vpop.f32.mrb[13].mxu1 }
0x1b1a   :  { %v1443_v49 = vadd.f32 %v1441_v32, %v4350_v48 }
0x1b1c   :  { %3845 = vtanh.f32 %v1443_v49  ;;  %v3066_v52 = vmul.f32 -1.442695, %v1443_v49 }
0x1b1e   :  { %3847 = vpow2.f32 %v3066_v52 }
0x1b26   :  { %v3846_v35 = vpop.eup %3845 }
0x1b27   :  { %1456 = vrot.lane.b32.xlu0 %v3846_v35, %s3906_s6 }
0x1b28   :  { %v3848_v54 = vpop.eup %3847 }
0x1b29   :  { %v1447_v4 = vadd.f32 1.0, %v3848_v54 }
0x1b2b   :  { %3849 = vrcp.f32 %v1447_v4 }
0x1b35   :  { %v3850_v55 = vpop.eup %3849 }
0x1b36   :  { %v1454_v61 = vmul.f32 %v3850_v55, %v1452_v60 }
0x1b99   :  { %v1457_v57 = vpop.permute.xlu0 %1456 }
0x1b9a   :  { %v1459_v58 = vmul.f32 %v3850_v55, %v1457_v57 }
0x1b9c   :  { %1461 = vrot.lane.b32.xlu1 %v1459_v58, %s3906_s6 }
0x1c0e   :  { %v1462_v63 = vpop.permute.xlu1 %1461 }
0x1c0f   :  { %v1464_v0 = vadd.f32 %v1462_v63, %v1454_v61 }
0x1c11   :  { %3851 = vtanh.f32 %v1464_v0  ;;  %v1562_v15 = vrot.slane %v1464_v0, 7 }
0x1c1b   :  { %v3852_v1 = vpop.eup %3851 }
0x1c1c   :  { %1467 = vrot.lane.b32.xlu0 %v3852_v1, %s3906_s6 }
0x1c8e   :  { %v1468_v3 = vpop.permute.xlu0 %1467 }
0x1c8f   :  { %v1470_v5 = vmul.f32 %v3850_v55, %v1468_v3 }
0x1c91   :  { %v1475_v40 = vrot.slane %v1470_v5, 1 }
0x1c93   :  { %1476 = vrot.lane.b32.xlu1 %v1475_v40, %s3907_s30 }
0x1d05   :  { %v4357_v11 = vpop.permute.xlu1 %1476 }
0x1d06   :  { %3439 = vmatmul.mubr.msk.f32.vlgmr.msra.gmra.mrb[12].mxu0 %vm188_vm7, %v4357_v11 }
0x1d07   :  { %3643 = vmatpush3.bf16.msra.mxu0 %v4252_v50  ;;  %3460 = vmatprep.mubr.msk.f32.mxu0 %vm3903_vm0, %v3904_v13 }
0x1d08   :  { %3644 = vmatprep.subr.bf16.mxu0 %v3902_v2 }
0x1d0b   :  { %3646 = vmatpush3.bf16.msra.mxu0 %v4263_v53 }
0x1d0c   :  { %3653 = vmatprep.subr.bf16.mxu0 %v3902_v2 }
0x1dd9   :  { %v1546_v6 = vpop.f32.mrb[12].mxu0 }
0x1dda   :  { %v1551_v51 = vrot.slane %v1546_v6, 6  ;;  %v3440_v59 = vpop.f32.mrb[13].mxu0 }
0x1ddc   :  { %v1553_v8 = vadd.f32 %v1551_v51, %v4371_v7 }
0x1dde   :  { %3853 = vtanh.f32 %v1553_v8  ;;  %v3068_v10 = vmul.f32 -1.442695, %v1553_v8 }
0x1de0   :  { %3855 = vpow2.f32 %v3068_v10 }
0x1de8   :  { %v3854_v9 = vpop.eup %3853 }
0x1de9   :  { %1566 = vrot.lane.b32.xlu0 %v3854_v9, %s3906_s6 }
0x1dea   :  { %v3856_v12 = vpop.eup %3855 }
0x1deb   :  { %v1557_v22 = vadd.f32 1.0, %v3856_v12 }
0x1ded   :  { %3857 = vrcp.f32 %v1557_v22 }
0x1df7   :  { %v3858_v14 = vpop.eup %3857 }
0x1df8   :  { %v1564_v16 = vmul.f32 %v3858_v14, %v1562_v15 }
0x1e5b   :  { %v1567_v29 = vpop.permute.xlu0 %1566 }
0x1e5c   :  { %v1569_v62 = vmul.f32 %v3858_v14, %v1567_v29 }
0x1e5e   :  { %1571 = vrot.lane.b32.xlu1 %v1569_v62, %s3906_s6 }
0x1ed0   :  { %v1572_v17 = vpop.permute.xlu1 %1571 }
0x1ed1   :  { %v1574_v19 = vadd.f32 %v1572_v17, %v1564_v16 }
0x1ed3   :  { %3859 = vtanh.f32 %v1574_v19  ;;  %v1672_v47 = vrot.slane %v1574_v19, 7 }
0x1edd   :  { %v3860_v20 = vpop.eup %3859 }
0x1ede   :  { %1577 = vrot.lane.b32.xlu0 %v3860_v20, %s3906_s6 }
0x1f50   :  { %v1578_v25 = vpop.permute.xlu0 %1577 }
0x1f51   :  { %v1580_v26 = vmul.f32 %v3858_v14, %v1578_v25 }
0x1f53   :  { %v1585_v27 = vrot.slane %v1580_v26, 2 }
0x1f55   :  { %1586 = vrot.lane.b32.xlu1 %v1585_v27, %s3907_s30 }
0x1fc7   :  { %v4378_v28 = vpop.permute.xlu1 %1586 }
0x1fc8   :  { %3450 = vmatmul.mubr.msk.f32.vlgmr.msra.gmra.mrb[14].mxu1 %vm188_vm7, %v4378_v28 }
0x1fc9   :  { %3649 = vmatpush3.bf16.msra.mxu1 %v4252_v50  ;;  %3471 = vmatprep.mubr.msk.f32.mxu1 %vm3903_vm0, %v3904_v13 }
0x1fca   :  { %3650 = vmatprep.subr.bf16.mxu1 %v3902_v2 }
0x1fcd   :  { %3652 = vmatpush3.bf16.msra.mxu1 %v4263_v53 }
0x1fce   :  { %3659 = vmatprep.subr.bf16.mxu1 %v3902_v2 }
0x209b   :  { %v1656_v31 = vpop.f32.mrb[14].mxu1 }
0x209c   :  { %v1661_v45 = vrot.slane %v1656_v31, 5  ;;  %v3451_v33 = vpop.f32.mrb[15].mxu1 }
0x209e   :  { %v1663_v36 = vadd.f32 %v1661_v45, %v4392_v34 }
0x20a0   :  { %3861 = vtanh.f32 %v1663_v36  ;;  %v3070_v39 = vmul.f32 -1.442695, %v1663_v36 }
0x20a2   :  { %3863 = vpow2.f32 %v3070_v39 }
0x20aa   :  { %v3862_v38 = vpop.eup %3861 }
0x20ab   :  { %1676 = vrot.lane.b32.xlu0 %v3862_v38, %s3906_s6 }
0x20ac   :  { %v3864_v56 = vpop.eup %3863 }
0x20ad   :  { %v1667_v41 = vadd.f32 1.0, %v3864_v56 }
0x20af   :  { %3865 = vrcp.f32 %v1667_v41 }
0x20b9   :  { %v3866_v43 = vpop.eup %3865 }
0x20ba   :  { %v1674_v44 = vmul.f32 %v3866_v43, %v1672_v47 }
0x211d   :  { %v1677_v46 = vpop.permute.xlu0 %1676 }
0x211e   :  { %v1679_v32 = vmul.f32 %v3866_v43, %v1677_v46 }
0x2120   :  { %1681 = vrot.lane.b32.xlu1 %v1679_v32, %s3906_s6 }
0x2192   :  { %v1682_v18 = vpop.permute.xlu1 %1681 }
0x2193   :  { %v1684_v49 = vadd.f32 %v1682_v18, %v1674_v44 }
0x2195   :  { %3867 = vtanh.f32 %v1684_v49  ;;  %v1779_v6 = vrot.slane %v1684_v49, 7 }
0x219f   :  { %v3868_v35 = vpop.eup %3867 }
0x21a0   :  { %1687 = vrot.lane.b32.xlu0 %v3868_v35, %s3906_s6 }
0x2212   :  { %v1688_v52 = vpop.permute.xlu0 %1687 }
0x2213   :  { %v1690_v54 = vmul.f32 %v3866_v43, %v1688_v52 }
0x2215   :  { %v1692_v4 = vrot.slane %v1690_v54, 3 }
0x2217   :  { %1693 = vrot.lane.b32.xlu1 %v1692_v4, %s3907_s30 }
0x2289   :  { %v4399_v55 = vpop.permute.xlu1 %1693 }
0x228a   :  { %3461 = vmatmul.mubr.msk.f32.vlgmr.msra.gmra.mrb[14].mxu0 %vm188_vm7, %v4399_v55 }
0x228b   :  { %3655 = vmatpush3.bf16.msra.mxu0 %v4252_v50  ;;  %3482 = vmatprep.mubr.msk.f32.mxu0 %vm3903_vm0, %v3904_v13 }
0x228c   :  { %3656 = vmatprep.subr.bf16.mxu0 %v3902_v2 }
0x228f   :  { %3658 = vmatpush3.bf16.msra.mxu0 %v4263_v53 }
0x2290   :  { %3665 = vmatprep.subr.bf16.mxu0 %v3902_v2 }
0x235d   :  { %v1763_v57 = vpop.f32.mrb[14].mxu0 }
0x235e   :  { %v1768_v58 = vrot.slane %v1763_v57, 4  ;;  %v3462_v60 = vpop.f32.mrb[15].mxu0 }
0x2360   :  { %v1770_v61 = vadd.f32 %v1768_v58, %v4329_v21 }
0x2362   :  { %3869 = vtanh.f32 %v1770_v61  ;;  %v3072_v0 = vmul.f32 -1.442695, %v1770_v61 }
0x2364   :  { %3871 = vpow2.f32 %v3072_v0 }
0x236c   :  { %v3870_v63 = vpop.eup %3869 }
0x236d   :  { %1783 = vrot.lane.b32.xlu0 %v3870_v63, %s3906_s6 }
0x236e   :  { %v3872_v1 = vpop.eup %3871 }
0x236f   :  { %v1774_v3 = vadd.f32 1.0, %v3872_v1 }
0x2371   :  { %3873 = vrcp.f32 %v1774_v3 }
0x237b   :  { %v3874_v5 = vpop.eup %3873 }
0x237c   :  { %v1781_v51 = vmul.f32 %v3874_v5, %v1779_v6 }
0x23df   :  { %v1784_v40 = vpop.permute.xlu0 %1783 }
0x23e0   :  { %v1786_v37 = vmul.f32 %v3874_v5, %v1784_v40 }
0x23e2   :  { %1788 = vrot.lane.b32.xlu1 %v1786_v37, %s3906_s6 }
0x2454   :  { %v1789_v59 = vpop.permute.xlu1 %1788 }
0x2455   :  { %v1791_v8 = vadd.f32 %v1789_v59, %v1781_v51 }
0x2457   :  { %3875 = vtanh.f32 %v1791_v8 }
0x2461   :  { %v3876_v21 = vpop.eup %3875 }
0x2462   :  { %1794 = vrot.lane.b32.xlu0 %v3876_v21, %s3906_s6 }
0x24d4   :  { %v1795_v9 = vpop.permute.xlu0 %1794 }
0x24d5   :  { %v1797_v10 = vmul.f32 %v3874_v5, %v1795_v9 }
0x24d7   :  { %v1799_v12 = vrot.slane %v1797_v10, 4 }
0x24d9   :  { %1800 = vrot.lane.b32.xlu1 %v1799_v12, %s3907_s30 }
0x254b   :  { %v4414_v22 = vpop.permute.xlu1 %1800 }
0x254c   :  { %3472 = vmatmul.mubr.msk.f32.vlgmr.msra.gmra.mrb[16].mxu1 %vm188_vm7, %v4414_v22 }
0x254d   :  { %3661 = vmatpush3.bf16.msra.mxu1 %v4252_v50  ;;  %3493 = vmatprep.mubr.msk.f32.mxu1 %vm3903_vm0, %v3904_v13 }
0x254e   :  { %3662 = vmatprep.subr.bf16.mxu1 %v3902_v2 }
0x2551   :  { %3664 = vmatpush3.bf16.msra.mxu1 %v4263_v53  ;;  %v1886_v53 = vrot.slane %v1791_v8, 7 }
0x2552   :  { %3507 = vmatprep.subr.mxu1 %v3904_v13 }
0x261f   :  { %v1870_v14 = vpop.f32.mrb[16].mxu1 }
0x2620   :  { %v1875_v29 = vrot.slane %v1870_v14, 3  ;;  %v3473_v62 = vpop.f32.mrb[17].mxu1 }
0x2621   :  { %v2167_v62 = vld [vmem:[%s4789_s10] sm:$0xff] }
0x2622   :  { %v1877_v15 = vadd.f32 %v1875_v29, %v4350_v48  ;;  %v2252_v29 = vld [vmem:[%s4788_s2] sm:$0x3] }
0x2624   :  { %3877 = vtanh.f32 %v1877_v15  ;;  %v3074_v17 = vmul.f32 -1.442695, %v1877_v15  ;;  %v2168_v15 = vld [vmem:[%s4789_s10 + $0x8] sm:$0xff] }
0x2626   :  { %3879 = vpow2.f32 %v3074_v17  ;;  %v2169_v17 = vld [vmem:[%s4789_s10 + $0x10] sm:$0xff] }
0x262e   :  { %v3878_v16 = vpop.eup %3877 }
0x262f   :  { %1890 = vrot.lane.b32.xlu0 %v3878_v16, %s3906_s6  ;;  %v3666_v16 = vpack.c.bf16 %v2168_v15, %v2167_v62  ;;  %v2509_v62 = vld [vmem:[%s4792_s14 + $0x18] sm:$0xff]  ;;  %v2508_v15 = vld [vmem:[%s4792_s14 + $0x10] sm:$0xff] }
0x2630   :  { %v3880_v50 = vpop.eup %3879 }
0x2631   :  { %v1881_v19 = vadd.f32 1.0, %v3880_v50  ;;  %v2170_v50 = vld [vmem:[%s4789_s10 + $0x18] sm:$0xff] }
0x2633   :  { %3881 = vrcp.f32 %v1881_v19  ;;  %v3669_v19 = vpack.c.bf16 %v2170_v50, %v2169_v17 }
0x263d   :  { %v3882_v20 = vpop.eup %3881 }
0x263e   :  { %v1888_v27 = vmul.f32 %v3882_v20, %v1886_v53 }
0x26a1   :  { %v1891_v25 = vpop.permute.xlu0 %1890 }
0x26a2   :  { %v1893_v26 = vmul.f32 %v3882_v20, %v1891_v25 }
0x26a4   :  { %1895 = vrot.lane.b32.xlu1 %v1893_v26, %s3906_s6 }
0x2716   :  { %v1896_v30 = vpop.permute.xlu1 %1895 }
0x2717   :  { %v1898_v31 = vadd.f32 %v1896_v30, %v1888_v27  ;;  %v2134_v30 = vsel %vm172_vm9, %v4399_v55, %v4414_v22 }
0x2719   :  { %3883 = vtanh.f32 %v1898_v31  ;;  %v1993_v52 = vrot.slane %v1898_v31, 7  ;;  %v2135_v31 = vsel %vm172_vm9, %v4414_v22, %v4399_v55 }
0x271a   :  { %v2149_v55 = vrot.slane %v2135_v31, 4 }
0x2723   :  { %v3884_v48 = vpop.eup %3883 }
0x2724   :  { %1901 = vrot.lane.b32.xlu0 %v3884_v48, %s3906_s6 }
0x2796   :  { %v1902_v45 = vpop.permute.xlu0 %1901 }
0x2797   :  { %v1904_v33 = vmul.f32 %v3882_v20, %v1902_v45 }
0x2799   :  { %v1906_v36 = vrot.slane %v1904_v33, 5 }
0x279b   :  { %1907 = vrot.lane.b32.xlu1 %v1906_v36, %s3907_s30 }
0x280d   :  { %v4429_v38 = vpop.permute.xlu1 %1907 }
0x280e   :  { %3483 = vmatmul.mubr.msk.f32.vlgmr.msra.gmra.mrb[16].mxu0 %vm188_vm7, %v4429_v38  ;;  %v2131_v27 = vsel %vm172_vm9, %v4378_v28, %v4429_v38  ;;  %v2136_v33 = vsel %vm172_vm9, %v4429_v38, %v4378_v28  ;;  %v2335_v28 = vld [vmem:[%s4790_s12 + $0x10] sm:$0xff]  ;;  %v2338_v38 = vld [vmem:[%s4790_s12 + $0x28] sm:$0xff] }
0x280f   :  { %3504 = vmatprep.mubr.msk.f32.mxu0 %vm3903_vm0, %v3904_v13  ;;  %3667 = vmatpush3.bf16.msra.mxu0 %v3666_v16  ;;  %v2143_v36 = vrot.slane %v2131_v27, 6  ;;  %v2511_v16 = vld [vmem:[%s4792_s14 + $0x28] sm:$0xff]  ;;  %v2514_v27 = vld [vmem:[%s4792_s14 + $0x40] sm:$0xff] }
0x2810   :  { %3668 = vmatprep.subr.bf16.mxu0 %v3902_v2  ;;  %v3694_v50 = vpack.c.bf16 %v2511_v16, %v2508_v15  ;;  %v2726_v15 = vld [vmem:[%s4793_s16 + $0xf0] sm:$0xff]  ;;  %v2727_v16 = vld [vmem:[%s4793_s16 + $0xf8] sm:$0xff] }
0x2813   :  { %3670 = vmatpush3.bf16.msra.mxu0 %v3669_v19  ;;  %v2513_v19 = vld [vmem:[%s4792_s14 + $0x38] sm:$0xff] }
0x2814   :  { %3679 = vmatprep.subr.bf16.mxu0 %v3902_v2 }
0x28e1   :  { %v1977_v39 = vpop.f32.mrb[16].mxu0 }
0x28e2   :  { %v1982_v56 = vrot.slane %v1977_v39, 2  ;;  %v3484_v41 = vpop.f32.mrb[17].mxu0 }
0x28e4   :  { %v1984_v43 = vadd.f32 %v1982_v56, %v4371_v7  ;;  %v2146_v56 = vrot.slane %v2134_v30, 5  ;;  %v2517_v30 = vld [vmem:[%s4792_s14 + $0x58] sm:$0xff] }
0x28e6   :  { %3885 = vtanh.f32 %v1984_v43  ;;  %v3076_v32 = vmul.f32 -1.442695, %v1984_v43 }
0x28e8   :  { %3887 = vpow2.f32 %v3076_v32  ;;  %v2152_v32 = vrot.slane %v2136_v33, 3  ;;  %v2713_v33 = vld [vmem:[%s4793_s16 + $0x88] sm:$0xff] }
0x28f0   :  { %v3886_v46 = vpop.eup %3885 }
0x28f1   :  { %1997 = vrot.lane.b32.xlu0 %v3886_v46, %s3906_s6 }
0x28f2   :  { %v3888_v47 = vpop.eup %3887 }
0x28f3   :  { %v1988_v44 = vadd.f32 1.0, %v3888_v47 }
0x28f5   :  { %3889 = vrcp.f32 %v1988_v44 }
0x28ff   :  { %v3890_v18 = vpop.eup %3889 }
0x2900   :  { %v1995_v54 = vmul.f32 %v3890_v18, %v1993_v52 }
0x2963   :  { %v1998_v49 = vpop.permute.xlu0 %1997 }
0x2964   :  { %v2000_v35 = vmul.f32 %v3890_v18, %v1998_v49 }
0x2966   :  { %2002 = vrot.lane.b32.xlu1 %v2000_v35, %s3906_s6 }
0x29d8   :  { %v2003_v4 = vpop.permute.xlu1 %2002 }
0x29d9   :  { %v2005_v57 = vadd.f32 %v2003_v4, %v1995_v54  ;;  %v2341_v54 = vld [vmem:[%s4790_s12 + $0x40] sm:$0xff]  ;;  %v2344_v4 = vld [vmem:[%s4790_s12 + $0x58] sm:$0xff] }
0x29db   :  { %3891 = vtanh.f32 %v2005_v57  ;;  %v2100_v9 = vrot.slane %v2005_v57, 7  ;;  %v3683_v57 = vpack.c.bf16 %v2344_v4, %v2341_v54  ;;  %v2700_v54 = vld [vmem:[%s4793_s16 + $0x20] sm:$0xff]  ;;  %v2701_v4 = vld [vmem:[%s4793_s16 + $0x28] sm:$0xff] }
0x29e5   :  { %v3892_v7 = vpop.eup %3891 }
0x29e6   :  { %2008 = vrot.lane.b32.xlu0 %v3892_v7, %s3906_s6  ;;  %v3079_v7 = vld [vmem:[%s4791_s11] ss:$0 sm:$0xff] }
0x2a58   :  { %v2009_v58 = vpop.permute.xlu0 %2008 }
0x2a59   :  { %v2011_v60 = vmul.f32 %v3890_v18, %v2009_v58 }
0x2a5b   :  { %v2013_v61 = vrot.slane %v2011_v60, 6  ;;  %v2334_v60 = vld [vmem:[%s4790_s12 + $0x8] sm:$0xff] }
0x2a5d   :  { %2014 = vrot.lane.b32.xlu1 %v2013_v61, %s3907_s30  ;;  %v2337_v61 = vld [vmem:[%s4790_s12 + $0x20] sm:$0xff] }
0x2acf   :  { %v2015_v63 = vpop.permute.xlu1 %2014 }
0x2ad0   :  { %3494 = vmatmul.mubr.msk.f32.vlgmr.msra.gmra.mrb[18].mxu1 %vm188_vm7, %v2015_v63  ;;  %v2128_v53 = vsel %vm172_vm9, %v4357_v11, %v2015_v63  ;;  %v2137_v41 = vsel %vm172_vm9, %v2015_v63, %v4357_v11 }
0x2ad1   :  { %3509 = vmatprep.mubr.msk.f32.mxu1 %vm3903_vm0, %v3904_v13  ;;  %v2140_v48 = vrot.slane %v2128_v53, 7  ;;  %v2155_v47 = vrot.slane %v2137_v41, 2  ;;  %v2515_v53 = vld [vmem:[%s4792_s14 + $0x48] sm:$0xff] }
0x2ba3   :  { %v2084_v0 = vpop.f32.mrb[18].mxu1 }
0x2ba4   :  { %v2089_v1 = vrot.slane %v2084_v0, 1  ;;  %v3495_v3 = vpop.f32.mrb[19].mxu1  ;;  %v2333_v0 = vld [vmem:[%s4790_s12] sm:$0xff] }
0x2ba6   :  { %v2091_v5 = vadd.f32 %v2089_v1, %v4392_v34  ;;  %v2336_v1 = vld [vmem:[%s4790_s12 + $0x18] sm:$0xff] }
0x2ba8   :  { %3893 = vtanh.f32 %v2091_v5  ;;  %v3078_v37 = vmul.f32 -1.442695, %v2091_v5 }
0x2baa   :  { %3895 = vpow2.f32 %v3078_v37  ;;  %v2343_v37 = vld [vmem:[%s4790_s12 + $0x50] sm:$0xff] }
0x2bb2   :  { %v3894_v40 = vpop.eup %3893 }
0x2bb3   :  { %2104 = vrot.lane.b32.xlu0 %v3894_v40, %s3906_s6  ;;  %v2340_v40 = vld [vmem:[%s4790_s12 + $0x38] sm:$0xff] }
0x2bb4   :  { %v3896_v6 = vpop.eup %3895 }
0x2bb5   :  { %v2095_v51 = vadd.f32 1.0, %v3896_v6  ;;  %v3671_v6 = vpack.c.bf16 %v2337_v61, %v2334_v60  ;;  %v2702_v61 = vld [vmem:[%s4793_s16 + $0x30] sm:$0xff] }
0x2bb7   :  { %3897 = vrcp.f32 %v2095_v51 }
0x2bc1   :  { %v3898_v59 = vpop.eup %3897 }
0x2bc2   :  { %v2102_v10 = vmul.f32 %v3898_v59, %v2100_v9  ;;  %v2342_v9 = vld [vmem:[%s4790_s12 + $0x48] sm:$0xff] }
0x2c25   :  { %v2105_v8 = vpop.permute.xlu0 %2104 }
0x2c26   :  { %v2107_v21 = vmul.f32 %v3898_v59, %v2105_v8  ;;  %v3675_v8 = vpack.c.bf16 %v2343_v37, %v2340_v40  ;;  %v2704_v40 = vld [vmem:[%s4793_s16 + $0x40] sm:$0xff]  ;;  %v2705_v37 = vld [vmem:[%s4793_s16 + $0x48] sm:$0xff] }
0x2c28   :  { %2109 = vrot.lane.b32.xlu1 %v2107_v21, %s3906_s6  ;;  %v2339_v21 = vld [vmem:[%s4790_s12 + $0x30] sm:$0xff] }
0x2c9a   :  { %v2110_v12 = vpop.permute.xlu1 %2109 }
0x2c9b   :  { %v2112_v14 = vadd.f32 %v2110_v12, %v2102_v10  ;;  %v2507_v12 = vld [vmem:[%s4792_s14 + $0x8] sm:$0xff] }
0x2c9d   :  { %3899 = vtanh.f32 %v2112_v14  ;;  %v2510_v14 = vld [vmem:[%s4792_s14 + $0x20] sm:$0xff] }
0x2ca7   :  { %v3900_v34 = vpop.eup %3899 }
0x2ca8   :  { %2115 = vrot.lane.b32.xlu0 %v3900_v34, %s3906_s6  ;;  %v2506_v34 = vld [vmem:[%s4792_s14] sm:$0xff] }
0x2ca9   :  { %v3687_v17 = vpack.c.bf16 %v2509_v62, %v2506_v34  ;;  %v2708_v34 = vld [vmem:[%s4793_s16 + $0x60] sm:$0xff] }
0x2cac   :  { %2254 = vperm.xlu0 %3772, %v2252_v29   ;;  %v3685_v29 = vpack.c.bf16 %v2510_v14, %v2507_v12  ;;  %v2725_v12 = vld [vmem:[%s4793_s16 + $0xe8] sm:$0xff] }
0x2d1a   :  { %v2116_v20 = vpop.permute.xlu0 %2115 }
0x2d1b   :  { %v2118_v25 = vmul.f32 %v3898_v59, %v2116_v20  ;;  %v3673_v59 = vpack.c.bf16 %v2336_v1, %v2333_v0  ;;  %v2516_v20 = vld [vmem:[%s4792_s14 + $0x50] sm:$0xff]  ;;  %v2720_v0 = vld [vmem:[%s4793_s16 + $0xc0] sm:$0xff]  ;;  %v2721_v1 = vld [vmem:[%s4793_s16 + $0xc8] sm:$0xff] }
0x2d1d   :  { %v2121_v26 = vrot.slane %v2118_v25, 7  ;;  %v2512_v25 = vld [vmem:[%s4792_s14 + $0x30] sm:$0xff]  ;;  %s3908_s14 = smov 96  }
0x2d1e   :  { %v3691_v31 = vpack.c.bf16 %v2515_v53, %v2512_v25 }
0x2d1f   :  { %2122 = vrot.lane.b32.xlu1 %v2121_v26, %s3907_s30  ;;  %v3689_v26 = vpack.c.bf16 %v2516_v20, %v2513_v19  ;;  %v2711_v19 = vld [vmem:[%s4793_s16 + $0x78] sm:$0xff]  ;;  %v2728_v20 = vld [vmem:[%s4793_s16 + $0x100] sm:$0xff] }
0x2d2b   :  { %v2255_v58 = vpop.permute.xlu0 %2254 }
0x2d91   :  { %v2123_v45 = vpop.permute.xlu1 %2122 }
0x2d92   :  { %v2125_v39 = vsel %vm172_vm9, %v4336_v42, %v2123_v45  ;;  %v2138_v22 = vsel %vm172_vm9, %v2123_v45, %v4336_v42  ;;  %v3680_v42 = vpack.c.bf16 %v2338_v38, %v2335_v28  ;;  %v2712_v45 = vld [vmem:[%s4793_s16 + $0x80] sm:$0xff]  ;;  %v2714_v28 = vld [vmem:[%s4793_s16 + $0x90] sm:$0xff]  ;;  %v2715_v38 = vld [vmem:[%s4793_s16 + $0x98] sm:$0xff] }
0x2d93   :  { %v2160_v43 = vsel %vm1162_vm10, %v2125_v39, %v2140_v48  ;;  %v2158_v18 = vrot.slane %v2138_v22, 1  ;;  %v3697_v48 = vpack.c.bf16 %v2517_v30, %v2514_v27  ;;  %v2696_v22 = vld [vmem:[%s4793_s16] sm:$0xff] }
0x2d94   :  { %v2161_v46 = vsel %vm1164_vm11, %v2160_v43, %v2143_v36  ;;  %v4597_v36 = vpack.c.bf16 %v2713_v33, %v2712_v45  ;;  %v2518_v30 = vld [vmem:[%s4794_s15] sm:$0x7] }
0x2d95   :  { %v2162_v11 = vsel %vm1166_vm12, %v2161_v46, %v2146_v56  ;;  %v2697_v46 = vld [vmem:[%s4793_s16 + $0x8] sm:$0xff] }
0x2d96   :  { %v2163_v44 = vsel %vm1168_vm13, %v2162_v11, %v2149_v55  ;;  %v4620_v11 = vpack.c.bf16 %v2715_v38, %v2714_v28 }
0x2d97   :  { %v2164_v49 = vsel %vm1170_vm14, %v2163_v44, %v2152_v32  ;;  %v4618_v32 = vpack.c.bf16 %v2697_v46, %v2696_v22  ;;  %v2699_v44 = vld [vmem:[%s4793_s16 + $0x18] sm:$0xff] }
0x2d98   :  { %v2165_v35 = vsel %vm85_vm1, %v2164_v49, %v2155_v47  ;;  %vm2256_vm1 = vcmp.eq.s32.totalorder %v4056_v24, %v2255_v58  ;;  %v3677_v24 = vpack.c.bf16 %v2342_v9, %v2339_v21  ;;  %v2698_v47 = vld [vmem:[%s4793_s16 + $0x10] sm:$0xff]  ;;  %v2716_v49 = vld [vmem:[%s4793_s16 + $0xa0] sm:$0xff]  ;;  %v4657_v58 = vpack.c.bf16 %v2701_v4, %v2700_v54  ;;  %v2707_v9 = vld [vmem:[%s4793_s16 + $0x58] sm:$0xff] }
0x2d99   :  { %v2166_v52 = vsel %vm1173_vm15, %v2165_v35, %v2158_v18  ;;  %v3081_v10 = vsel %vm2256_vm1, 1.0, %v3904_v13  ;;  %v4637_v35 = vpack.c.bf16 %v2699_v44, %v2698_v47  ;;  %v2706_v21 = vld [vmem:[%s4793_s16 + $0x50] sm:$0xff] }
0x2d9a   :  { %3505 = vmatmul.mubr.msk.f32.vlgmr.msra.gmra.mrb[18].mxu0 %vm188_vm7, %v2166_v52 }
0x2d9b   :  { %3681 = vmatpush3.bf16.msra.mxu0 %v3680_v42  ;;  %3520 = vmatprep.mubr.msk.f32.mxu0 %vm3903_vm0, %v3904_v13  ;;  %v2717_v42 = vld [vmem:[%s4793_s16 + $0xa8] sm:$0xff] }
0x2d9c   :  { %3682 = vmatprep.subr.bf16.mxu0 %v3902_v2  ;;  %v4642_v52 = vpack.c.bf16 %v2717_v42, %v2716_v49 }
0x2d9f   :  { %3684 = vmatpush3.bf16.msra.mxu0 %v3683_v57  ;;  %v2718_v57 = vld [vmem:[%s4793_s16 + $0xb0] sm:$0xff] }
0x2da0   :  { %3693 = vmatprep.subr.bf16.mxu0 %v3902_v2 }
0x2e6d   :  { %v2247_v63 = vpop.f32.mrb[18].mxu0 }
0x2e6e   :  { %v2248_v3 = vadd.f32 %v3079_v7, %v2247_v63  ;;  %v3506_v5 = vpop.f32.mrb[19].mxu0  ;;  %v2719_v7 = vld [vmem:[%s4793_s16 + $0xb8] sm:$0xff] }
0x2e6f   :  { %v4660_v60 = vpack.c.bf16 %v2719_v7, %v2718_v57  ;;  %v2703_v63 = vld [vmem:[%s4793_s16 + $0x38] sm:$0xff]  ;;  %v4678_v5 = vpack.c.bf16 %v2721_v1, %v2720_v0 }
0x2e70   :  { %v2251_v51 = vmax.f32 %v2248_v3, 0.0  ;;  %v4675_v3 = vpack.c.bf16 %v2703_v63, %v2702_v61 }
0x2e72   :  { %3508 = vmatpush3.msra.mxu1 %v2251_v51  ;;  %3521 = vmatmul.mubr.msk.f32.vlgmr.msra.gmra.mrb[20].mxu0 %vm188_vm7, %v2251_v51 }
0x2e73   :  { %3510 = vmatmul.mubr.msk.f32.vlgmr.msra.gmra.mrb[20].mxu1 %vm2259_vm2, %v3081_v10  ;;  %3672 = vmatprep.subr.bf16.mxu1 %v3671_v6  ;;  %v2722_v6 = vld [vmem:[%s4793_s16 + $0xd0] sm:$0xff]  ;;  %v4705_v10 = vpack.c.bf16 %v2707_v9, %v2706_v21 }
0x2e74   :  { %3674 = vmatpush1.bf16.msra.mxu1 %v3673_v59  ;;  %2429 = vmatprep.mubr.f32.mxu1 %v3904_v13  ;;  %v4693_v59 = vpack.c.bf16 %v2705_v37, %v2704_v40 }
0x2e75   :  { %3676 = vmatprep.subr.bf16.mxu1 %v3675_v8  ;;  %3531 = vmatprep.mubr.msk.f32.mxu0 %vm3903_vm0, %v3904_v13 }
0x2e76   :  { %3695 = vmatpush3.bf16.msra.mxu0 %v3694_v50  ;;  %v2710_v50 = vld [vmem:[%s4793_s16 + $0x70] sm:$0xff] }
0x2e77   :  { %3696 = vmatprep.subr.bf16.mxu0 %v3902_v2  ;;  %v3729_v25 = vpack.c.bf16 %v2711_v19, %v2710_v50 }
0x2e78   :  { %3678 = vmatpush1.bf16.msra.mxu1 %v3677_v24  ;;  %v2724_v24 = vld [vmem:[%s4793_s16 + $0xe0] sm:$0xff] }
0x2e79   :  { %3686 = vmatprep.subr.bf16.mxu1 %v3685_v29  ;;  %v4715_v14 = vpack.c.bf16 %v2725_v12, %v2724_v24  ;;  %v2709_v29 = vld [vmem:[%s4793_s16 + $0x68] sm:$0xff] }
0x2e7a   :  { %3698 = vmatpush3.bf16.msra.mxu0 %v3697_v48  ;;  %v4723_v62 = vpack.c.bf16 %v2709_v29, %v2708_v34 }
0x2e7b   :  { %3083 = vmatmul.mubr.msk.f32.vlgmr.msra.gmra.mrb[22].mxu1 %vm188_vm7, %v2251_v51  ;;  %3534 = vmatprep.subr.mxu0 %v3904_v13  ;;  %v2723_v51 = vld [vmem:[%s4793_s16 + $0xd8] sm:$0xff] }
0x2e7c   :  { %2604 = vmatprep.mubr.f32.mxu1 %v3904_v13  ;;  %3688 = vmatpush1.bf16.msra.mxu1 %v3687_v17  ;;  %v4696_v8 = vpack.c.bf16 %v2723_v51, %v2722_v6  ;;  %v4733_v17 = vpack.c.bf16 %v2727_v16, %v2726_v15 }
0x2e7d   :  { %3690 = vmatprep.subr.bf16.mxu1 %v3689_v26  ;;  %v2348_v26 = vshrl.u32 %v56_v23, 7 }
0x2e7f   :  { %v2349_v53 = vsub.s32 0, %v2348_v26  ;;  %v2357_v27 = vsub.s32 2, %v2348_v26  ;;  %v2353_v48 = vsub.s32 1, %v2348_v26 }
0x2e80   :  { %3692 = vmatpush1.bf16.msra.mxu1 %v3691_v31  ;;  %v2345_v31 = vld [vmem:[%s4795_s13] sm:$0x7]  ;;  %s3909_s13 = smov 8  }
0x2e81   :  { %3700 = vmatprep.subr.bf16.mxu1 %v4597_v36  ;;  %v2523_v45 = vrot.slane %v2518_v30, %v2349_v53  ;;  %v2531_v33 = vrot.slane %v2518_v30, %v2357_v27 }
0x2f45   :  { %v4600_v39 = vpop.f32.mrb[20].mxu0 }
0x2f46   :  { %v2329_v56 = vpop.f32.mrb[20].mxu1  ;;  %v3522_v2 = vpop.f32.mrb[21].mxu0 }
0x2f47   :  { %2536 = vrot.lane.b32.xlu1 %v2329_v56, %s3908_s14  ;;  %v3511_v41 = vpop.f32.mrb[21].mxu1  ;;  %v2358_v56 = vrot.slane %v2345_v31, %v2357_v27  ;;  %v2350_v2 = vrot.slane %v2345_v31, %v2349_v53 }
0x2f48   :  { %v2354_v41 = vrot.slane %v2345_v31, %v2353_v48 }
0x2f49   :  { %v2503_v44 = vadd.f32 %v4600_v39, %v2358_v56 }
0x2f4e   :  { %v4602_v43 = vpop.f32.mrb[22].mxu1 }
0x2f4f   :  { %v4604_v55 = vpop.f32.mrb[23].mxu1 }
0x2f50   :  { %v2434_v7 = vadd.f32 %v4604_v55, %v2354_v41 }
0x2fb9   :  { %v2537_v18 = vpop.permute.xlu1 %2536 }
0x2fba   :  { %3085 = vmatmul.mubr.msk.f32.vlgmr.msra.gmra.mrb[24].mxu1 %vm188_vm7, %v2537_v18  ;;  %3532 = vmatmul.mubr.msk.f32.vlgmr.msra.gmra.mrb[22].mxu0 %vm188_vm7, %v2537_v18  ;;  %v2432_v18 = vadd.f32 %v4602_v43, %v2350_v2 }
0x2fbb   :  { %3702 = vmatpush3.bf16.msra.mxu1 %v4618_v32  ;;  %3536 = vmatprep.mubr.msk.f32.mxu0 %vm3903_vm0, %v3904_v13 }
0x2fbc   :  { %3704 = vmatprep.subr.bf16.mxu1 %v4620_v11  ;;  %3535 = vmatpush3.msra.mxu0 %v2728_v20 }
0x2fbd   :  { %3732 = vmatprep.subr.bf16.mxu0 %v4597_v36  ;;  %v2527_v36 = vrot.slane %v2518_v30, %v2353_v48 }
0x2fbf   :  { %3706 = vmatpush3.bf16.msra.mxu1 %v4637_v35 }
0x2fc0   :  { %3708 = vmatprep.subr.bf16.mxu1 %v4642_v52 }
0x2fc3   :  { %3710 = vmatpush3.bf16.msra.mxu1 %v4657_v58 }
0x2fc4   :  { %3712 = vmatprep.subr.bf16.mxu1 %v4660_v60 }
0x2fc7   :  { %3714 = vmatpush3.bf16.msra.mxu1 %v4675_v3 }
0x2fc8   :  { %3716 = vmatprep.subr.bf16.mxu1 %v4678_v5 }
0x2fcb   :  { %3718 = vmatpush3.bf16.msra.mxu1 %v4693_v59 }
0x2fcc   :  { %3720 = vmatprep.subr.bf16.mxu1 %v4696_v8 }
0x2fcf   :  { %3722 = vmatpush3.bf16.msra.mxu1 %v4705_v10 }
0x2fd0   :  { %3724 = vmatprep.subr.bf16.mxu1 %v4715_v14 }
0x2fd3   :  { %3726 = vmatpush3.bf16.msra.mxu1 %v4723_v62 }
0x2fd4   :  { %3728 = vmatprep.subr.bf16.mxu1 %v4733_v17 }
0x2fd7   :  { %3730 = vmatpush3.bf16.msra.mxu1 %v3729_v25 }
0x2fd8   :  { %3539 = vmatprep.subr.mxu1 %v3904_v13 }
0x308d   :  { %v2606_v22 = vpop.f32.mrb[24].mxu1  ;;  %v2677_v46 = vpop.f32.mrb[22].mxu0 }
0x308e   :  { %v2607_v23 = vadd.f32 %v2606_v22, %v2523_v45  ;;  %v2678_v28 = vadd.f32 %v2677_v46, %v2531_v33  ;;  %v2608_v38 = vpop.f32.mrb[25].mxu1  ;;  %v3533_v47 = vpop.f32.mrb[23].mxu0 }
0x308f   :  { %v2609_v49 = vadd.f32 %v2608_v38, %v2527_v36 }
0x3090   :  { %v2684_v42 = vrot.slane %v2607_v23, %v2349_v53  ;;  %v2875_v54 = vrot.slane %v2607_v23, %v2353_v48  ;;  %v2692_v4 = vrot.slane %v2678_v28, %v2349_v53  ;;  %v2883_v57 = vrot.slane %v2678_v28, %v2353_v48 }
0x3091   :  { %v2688_v61 = vrot.slane %v2609_v49, %v2349_v53  ;;  %v2879_v63 = vrot.slane %v2609_v49, %v2353_v48 }
0x3092   :  { %v2693_v0 = vmul.f32 %v2684_v42, %v2432_v18  ;;  %v2884_v1 = vmul.f32 %v2875_v54, %v2432_v18  ;;  %v2695_v40 = vmul.f32 %v2692_v4, %v2503_v44  ;;  %v2886_v37 = vmul.f32 %v2883_v57, %v2503_v44 }
0x3093   :  { %v2694_v6 = vmul.f32 %v2688_v61, %v2434_v7  ;;  %v2885_v51 = vmul.f32 %v2879_v63, %v2434_v7 }
0x3094   :  { %3537 = vmatmul.mubr.msk.f32.vlgmr.msra.gmra.mrb[24].mxu0 %vm2259_vm2, %v2695_v40 }
0x3095   :  { %3734 = vmatpush3.bf16.msra.mxu0 %v4618_v32  ;;  %2796 = vmatprep.mubr.f32.mxu1 %v2694_v6 }
0x3096   :  { %2954 = vmatprep.mubr.f32.mxu0 %v2885_v51  ;;  %2797 = vmatmul.mubr.f32.vlgmr.msra.gmra.mrb[26].mxu1 %v2693_v0 }
0x3097   :  { %3736 = vmatprep.subr.bf16.mxu0 %v4620_v11  ;;  %3540 = vmatpush3.msra.mxu1 %v2728_v20 }
0x3098   :  { %3541 = vmatprep.mubr.msk.f32.mxu1 %vm3903_vm0, %v3904_v13  ;;  %vm3035_vm0 = vcmask 130048  }
0x3099   :  { %3738 = vmatpush3.bf16.msra.mxu0 %v4637_v35 }
0x309a   :  { %3542 = vmatmul.mubr.msk.f32.vlgmr.msra.gmra.mrb[28].mxu1 %vm2259_vm2, %v2886_v37  ;;  %3740 = vmatprep.subr.bf16.mxu0 %v4642_v52 }
0x309d   :  { %3742 = vmatpush3.bf16.msra.mxu0 %v4657_v58 }
0x309e   :  { %3744 = vmatprep.subr.bf16.mxu0 %v4660_v60 }
0x30a1   :  { %3746 = vmatpush3.bf16.msra.mxu0 %v4675_v3 }
0x30a2   :  { %3748 = vmatprep.subr.bf16.mxu0 %v4678_v5 }
0x30a5   :  { %3750 = vmatpush3.bf16.msra.mxu0 %v4693_v59 }
0x30a6   :  { %3752 = vmatprep.subr.bf16.mxu0 %v4696_v8 }
0x30a9   :  { %3754 = vmatpush3.bf16.msra.mxu0 %v4705_v10 }
0x30aa   :  { %3756 = vmatprep.subr.bf16.mxu0 %v4715_v14 }
0x30ad   :  { %3758 = vmatpush3.bf16.msra.mxu0 %v4723_v62 }
0x30ae   :  { %3760 = vmatprep.subr.bf16.mxu0 %v4733_v17 }
0x30b1   :  { %3762 = vmatpush3.bf16.msra.mxu0 %v3729_v25 }
0x30b4   :  { %2955 = vmatmul.mubr.f32.vlgmr.msra.gmra.mrb[26].mxu0 %v2884_v1 }
0x3167   :  { %v2868_v13 = vpop.f32.mrb[24].mxu0 }
0x3168   :  { %v3538_v39 = vpop.f32.mrb[25].mxu0 }
0x3169   :  { %v3237_v43 = vpop.f32.mrb[26].mxu1 }
0x316a   :  { %v3238_v55 = vpop.f32.mrb[27].mxu1 }
0x316b   :  { %v3239_v32 = vadd.f32 %v3238_v55, %v3237_v43 }
0x316d   :  { %v2869_v11 = vadd.f32 %v3239_v32, %v2868_v13  ;;  %v3026_v35 = vpop.f32.mrb[28].mxu1 }
0x316e   :  { %v3543_v52 = vpop.f32.mrb[29].mxu1 }
0x3187   :  { %v3274_v58 = vpop.f32.mrb[26].mxu0 }
0x3188   :  { %v3275_v60 = vpop.f32.mrb[27].mxu0 }
0x3189   :  { %v3276_v3 = vadd.f32 %v3275_v60, %v3274_v58 }
0x318b   :  { %v3027_v5 = vadd.f32 %v3276_v3, %v3026_v35 }
0x318d   :  { %3031 = vrot.lane.b32.xlu0 %v3027_v5, %s3909_s13 }
0x31ff   :  { %v3032_v59 = vpop.permute.xlu0 %3031 }
0x3200   :  { %v3034_v8 = vsel %vm2259_vm2, %v2869_v11, %v3032_v59 }
0x3201   :  { %3036 = vst.msk [vmem:[%s4796_s17] sm:$0xff] %vm3035_vm0, %v3034_v8 }

</bundles_post_ra>
